<compile_context>
chip_gen: v7x
topology: tpu7x:2x2x1
jax: 0.10.0
libtpu: 0.0.40
codegen_flags: <defaults>
</compile_context>

<pallas_src>
import jax
import jax.numpy as jnp
from jax.experimental import pallas as pl
from jax.experimental.pallas import tpu as pltpu


def _feature_sim_kernel(p_ref, t_ref, out_ref):
    """Whole FeatureSimilarityLoss contraction in one step.

    p_ref  : (B, C, HW) VMEM = pred_feats.reshape(B, C, HW);  p[b, k, i] = pred_r[b, i, k]
    t_ref  : (C, B, HW) VMEM = true_feats with leading dims swapped;
             t[b, j, k] = true_r[j, k, b]
    out_ref: (1,) SMEM  = sum(lse2) - sum(lse1)
    """
    p = p_ref[...]                                   # (B, C, HW)
    t = t_ref[...]                                   # (B, Bj, HW)  (leading dim plays 'b')
    hw = p.shape[2]

    # s[b, j, i] = sim_matrix[b, i, j] / (H*W); scale folded into the f32 operand.
    # One batched MXU matmul over the leading dim instead of B tiny ones.
    s = jnp.einsum('bjk,bki->bji', t * (1.0 / hw), p,
                   preferred_element_type=jnp.float32)          # (B, Bj, HW)

    # logsumexp over j (axis=1) -> (B, 1, HW); only its total sum is needed.
    m1 = jnp.max(s, axis=1, keepdims=True)
    lse1 = m1 + jnp.log(jnp.sum(jnp.exp(s - m1), axis=1, keepdims=True))

    # logsumexp over the spatial axis of the already-resident pred tile -> (B, C, 1).
    m2 = jnp.max(p, axis=2, keepdims=True)
    lse2 = m2 + jnp.log(jnp.sum(jnp.exp(p - m2), axis=2, keepdims=True))

    out_ref[0] = jnp.sum(lse2) - jnp.sum(lse1)


@jax.jit
def get_loss(pred, target, trans_feat, pred_feats, true_feats):
    """pred: (Bp, K) log-probs; target: (Bp,) int labels;
       trans_feat: dict with 'mu', 'logvar';
       pred_feats/true_feats: (B, C, H, W) with B == C == H*W (module constraint)."""
    B, C, H, W = pred_feats.shape
    HW = H * W
    # The original module's matmul only type-checks when B == C == H*W.
    assert B == C == HW, f"GetLoss requires B == C == H*W, got B={B}, C={C}, H*W={HW}"

    pred_flat = pred_feats.reshape(B, C, HW).astype(jnp.float32)                      # free reshape
    true_swap = jnp.transpose(true_feats, (1, 0, 2, 3)).reshape(C, B, HW).astype(jnp.float32)
    # TODO(synk): once H*W grows (>=128 f32 per contiguous chunk), drop the wrapper
    # transpose in favour of a strided BlockSpec gather, tile the grid over batch /
    # spatial with an online logsumexp, cast matmul operands to bf16 (scale AFTER the
    # matmul), and budget tiles against v7x's 64 MiB VMEM (32 MiB scoped default).

    sim_diff = pl.pallas_call(
        _feature_sim_kernel,
        in_specs=[pl.BlockSpec(memory_space=pltpu.MemorySpace.VMEM),
                  pl.BlockSpec(memory_space=pltpu.MemorySpace.VMEM)],
        out_specs=pl.BlockSpec(memory_space=pltpu.MemorySpace.SMEM),
        out_shape=jax.ShapeDtypeStruct((1,), jnp.float32),
    )(pred_flat, true_swap)

    # mean(-lse1 + lse2) in the module relies on HW == C, so it equals
    # (sum(lse2) - sum(lse1)) / (B * HW).
    sim_loss = 0.1 * sim_diff[0] / (B * HW)

    # Trivial terms computed in the same jit (XLA fuses them; keeping them out of
    # the kernel avoids tiny sub-vreg DMAs). Gather-based NLL matches torch
    # semantics even with -inf log-probs.
    nll = -jnp.mean(jnp.take_along_axis(pred, target[:, None], axis=1))
    mu, logvar = trans_feat['mu'], trans_feat['logvar']
    kld = 0.1 * (-0.5 * jnp.sum(1.0 + logvar - mu * mu - jnp.exp(logvar)) / mu.size)

    return nll + sim_loss + kld


def _reference(pred, target, trans_feat, pred_feats, true_feats):
    """Pure-JAX reference matching the PyTorch semantics."""
    B, C, H, W = pred_feats.shape
    nll = -jnp.mean(pred[jnp.arange(pred.shape[0]), target])
    pr = jnp.transpose(pred_feats, (0, 2, 3, 1)).reshape(B, H * W, C)
    tr = jnp.transpose(true_feats, (0, 2, 3, 1)).reshape(B, H * W, C)
    tt = jnp.transpose(tr, (2, 1, 0))
    sim = jnp.einsum('bik,bkj->bij', pr, tt) / (H * W)
    lse1 = jax.scipy.special.logsumexp(sim, axis=-1)
    lse2 = jax.scipy.special.logsumexp(jnp.transpose(pr, (0, 2, 1)), axis=-1)
    sim_loss = 0.1 * jnp.mean(-lse1 + lse2)
    mu, logvar = trans_feat['mu'], trans_feat['logvar']
    kld = 0.1 * (-0.5 * jnp.sum(1.0 + logvar - mu ** 2 - jnp.exp(logvar)) / mu.size)
    return nll + sim_loss + kld


if __name__ == "__main__":
    key = jax.random.PRNGKey(0)
    k1, k2, k3, k4, k5, k6 = jax.random.split(key, 6)

    # Constraint from the module's math: B == C == H*W
    B, C, H, W = 16, 16, 4, 4
    K = 10        # num classes
    D = 32        # latent dim for mu / logvar

    logits = jax.random.normal(k1, (B, K), dtype=jnp.float32)
    pred = jax.nn.log_softmax(logits, axis=-1)
    target = jax.random.randint(k2, (B,), 0, K, dtype=jnp.int32)
    mu = jax.random.normal(k3, (B, D), dtype=jnp.float32)
    logvar = 0.5 * jax.random.normal(k4, (B, D), dtype=jnp.float32)
    pred_feats = jax.random.normal(k5, (B, C, H, W), dtype=jnp.float32)
    true_feats = jax.random.normal(k6, (B, C, H, W), dtype=jnp.float32)
    trans_feat = {'mu': mu, 'logvar': logvar}

    out = get_loss(pred, target, trans_feat, pred_feats, true_feats)
    out = jax.block_until_ready(out)

    ref = _reference(pred, target, trans_feat, pred_feats, true_feats)
    assert jnp.allclose(out, ref, rtol=1e-4, atol=1e-4), (out, ref)

    print("KERNEL_OK")
</pallas_src>

<mosaic_0001>
module attributes {stable_mosaic.version = 11 : i64} {
  func.func @_feature_sim_kernel(%arg0: memref<16x16x16xf32, #tpu.memory_space<vmem>>, %arg1: memref<16x16x16xf32, #tpu.memory_space<vmem>>, %arg2: memref<1xf32, #tpu.memory_space<smem>>) attributes {dimension_semantics = [], scalar_prefetch = 0 : i64, scratch_operands = 0 : i64, tpu.core_type = #tpu.core_type<tc>} {
    %c0 = arith.constant 0 : index
    %c0_0 = arith.constant 0 : index
    %c0_1 = arith.constant 0 : index
    %0 = vector.load %arg0[%c0, %c0_0, %c0_1] : memref<16x16x16xf32, #tpu.memory_space<vmem>>, vector<16x16x16xf32>
    %c0_2 = arith.constant 0 : index
    %c0_3 = arith.constant 0 : index
    %c0_4 = arith.constant 0 : index
    %1 = vector.load %arg1[%c0_2, %c0_3, %c0_4] : memref<16x16x16xf32, #tpu.memory_space<vmem>>, vector<16x16x16xf32>
    %cst = arith.constant 6.250000e-02 : f32
    %2 = vector.broadcast %cst : f32 to vector<16x16x16xf32>
    %3 = arith.mulf %1, %2 : vector<16x16x16xf32>
    "tpu.trace_start"() <{level = 10 : i32, message = "bjk,bki->bji"}> : () -> ()
    %cst_5 = arith.constant dense<0.000000e+00> : vector<16x16x16xf32>
    %4 = tpu.matmul %3, %0, %cst_5 {dimension_numbers = #tpu.dot_dimension_numbers<[2], [1], [1], [2], [0, 0, 0, 1, 1, 2], [0], [0]>} : vector<16x16x16xf32>, vector<16x16x16xf32>, vector<16x16x16xf32> -> vector<16x16x16xf32>
    "tpu.trace_stop"() : () -> ()
    %cst_6 = arith.constant dense<0xFF800000> : vector<16x16xf32>
    %5 = vector.multi_reduction <maximumf>, %4, %cst_6 [1] : vector<16x16x16xf32> to vector<16x16xf32>
    %6 = vector.shape_cast %5 : vector<16x16xf32> to vector<16x1x16xf32>
    %7 = vector.broadcast %6 : vector<16x1x16xf32> to vector<16x16x16xf32>
    %8 = arith.subf %4, %7 : vector<16x16x16xf32>
    %9 = math.exp %8 : vector<16x16x16xf32>
    %cst_7 = arith.constant dense<0.000000e+00> : vector<16x16xf32>
    %10 = vector.multi_reduction <add>, %9, %cst_7 [1] : vector<16x16x16xf32> to vector<16x16xf32>
    %11 = vector.shape_cast %10 : vector<16x16xf32> to vector<16x1x16xf32>
    %12 = math.log %11 : vector<16x1x16xf32>
    %13 = arith.addf %6, %12 : vector<16x1x16xf32>
    %cst_8 = arith.constant dense<0xFF800000> : vector<16x16xf32>
    %14 = vector.multi_reduction <maximumf>, %0, %cst_8 [2] : vector<16x16x16xf32> to vector<16x16xf32>
    %15 = vector.shape_cast %14 : vector<16x16xf32> to vector<16x16x1xf32>
    %16 = vector.broadcast %15 : vector<16x16x1xf32> to vector<16x16x16xf32>
    %17 = arith.subf %0, %16 : vector<16x16x16xf32>
    %18 = math.exp %17 : vector<16x16x16xf32>
    %cst_9 = arith.constant dense<0.000000e+00> : vector<16x16xf32>
    %19 = vector.multi_reduction <add>, %18, %cst_9 [2] : vector<16x16x16xf32> to vector<16x16xf32>
    %20 = vector.shape_cast %19 : vector<16x16xf32> to vector<16x16x1xf32>
    %21 = math.log %20 : vector<16x16x1xf32>
    %22 = arith.addf %15, %21 : vector<16x16x1xf32>
    %23 = vector.shape_cast %22 : vector<16x16x1xf32> to vector<1x16x16x1xf32>
    %cst_10 = arith.constant dense<0.000000e+00> : vector<1xf32>
    %24 = vector.multi_reduction <add>, %23, %cst_10 [1, 2, 3] : vector<1x16x16x1xf32> to vector<1xf32>
    %25 = vector.shape_cast %24 : vector<1xf32> to vector<1x1x1x1xf32>
    %26 = vector.extract %25[0, 0, 0, 0] : f32 from vector<1x1x1x1xf32>
    %27 = vector.shape_cast %13 : vector<16x1x16xf32> to vector<1x16x1x16xf32>
    %cst_11 = arith.constant dense<0.000000e+00> : vector<1xf32>
    %28 = vector.multi_reduction <add>, %27, %cst_11 [1, 2, 3] : vector<1x16x1x16xf32> to vector<1xf32>
    %29 = vector.shape_cast %28 : vector<1xf32> to vector<1x1x1x1xf32>
    %30 = vector.extract %29[0, 0, 0, 0] : f32 from vector<1x1x1x1xf32>
    %31 = arith.subf %26, %30 : f32
    %c0_12 = arith.constant 0 : index
    %32 = memref.load %arg2[%c0_12] : memref<1xf32, #tpu.memory_space<smem>>
    memref.store %31, %arg2[%c0_12] : memref<1xf32, #tpu.memory_space<smem>>
    return
  }
}

</mosaic_0001>

<bundles_post_ra>
// kernel: get_loss.1
= control target key start
LH: loop header
LB: loop body
LE: loop exit
PB: predicated region body
PF: predicated region fallthrough
CT: control target
= control target key end

     0   :  { %vm108_vm0 = vcmask 130048   ;;  %s3851_s0 = inlined_call_operand.vmem [shape: f32[16,16,16], index: 0, kind: input, shape index: {}]   ;;  %s3852_s1 = inlined_call_operand.vmem [shape: f32[16,16,16], index: 1, kind: input, shape index: {}]   ;;  %s3853_s2 = inlined_call_operand.hbm [shape: f32[1], index: 2, kind: output, shape index: {}]  }
   0x1   :  { %v2883_v0 = vld [vmem:[%s3851_s0] sm:$0xff]  ;;  %v2888_v1 = vld [vmem:[%s3851_s0 + $0x10] sm:$0xff]  ;;  %v2893_v2 = vld [vmem:[%s3851_s0 + $0x8] sm:$0xff] }
   0x2   :  { %v1837_v3 = vsel %vm108_vm0, %v2883_v0, -inf  ;;  %v1843_v4 = vsel %vm108_vm0, %v2888_v1, -inf  ;;  %v2902_v5 = vld [vmem:[%s3851_s0 + $0x18] sm:$0xff]  ;;  %v2559_v6 = vpack.c.bf16 %v2893_v2, %v2883_v0  ;;  %v2909_v7 = vld [vmem:[%s3851_s0 + $0x20] sm:$0xff]  ;;  %v2914_v8 = vld [vmem:[%s3851_s0 + $0x28] sm:$0xff]  ;;  %v1840_v10 = vsel %vm108_vm0, %v2893_v2, -inf }
   0x3   :  { %1838 = vmax.xlane.f32.xlu0 %v1837_v3  ;;  %1844 = vmax.xlane.f32.xlu1 %v1843_v4  ;;  %v2563_v9 = vpack.c.bf16 %v2902_v5, %v2888_v1  ;;  %v1846_v11 = vsel %vm108_vm0, %v2902_v5, -inf  ;;  %v44_v12 = vld [vmem:[%s3852_s1] sm:$0xff]  ;;  %v45_v13 = vld [vmem:[%s3852_s1 + $0x8] sm:$0xff]  ;;  %v2567_v14 = vpack.c.bf16 %v2914_v8, %v2909_v7  ;;  %v46_v15 = vld [vmem:[%s3852_s1 + $0x10] sm:$0xff]  ;;  %v1849_v28 = vsel %vm108_vm0, %v2909_v7, -inf }
   0x4   :  { %2560 = vmatprep.subr.bf16.mxu0 %v2559_v6  ;;  %v2936_v16 = vld [vmem:[%s3851_s0 + $0x30] sm:$0xff]  ;;  %v2941_v17 = vld [vmem:[%s3851_s0 + $0x38] sm:$0xff]  ;;  %v76_v18 = vmul.f32 0.0625, %v44_v12  ;;  %v77_v19 = vmul.f32 0.0625, %v45_v13  ;;  %v78_v20 = vmul.f32 0.0625, %v46_v15  ;;  %v2949_v22 = vld [vmem:[%s3851_s0 + $0x48] sm:$0xff] }
   0x5   :  { %2562 = vmatpush3.bf16.msra.mxu0 %v2559_v6  ;;  %2564 = vmatprep.subr.bf16.mxu1 %v2563_v9  ;;  %v47_v21 = vld [vmem:[%s3852_s1 + $0x18] sm:$0xff]  ;;  %v2571_v24 = vpack.c.bf16 %v2941_v17, %v2936_v16  ;;  %v48_v25 = vld [vmem:[%s3852_s1 + $0x20] sm:$0xff]  ;;  %v49_v26 = vld [vmem:[%s3852_s1 + $0x28] sm:$0xff]  ;;  %v1852_v29 = vsel %vm108_vm0, %v2914_v8, -inf  ;;  %v1855_v42 = vsel %vm108_vm0, %v2936_v16, -inf  ;;  %v1858_v43 = vsel %vm108_vm0, %v2941_v17, -inf }
   0x6   :  { %2566 = vmatpush3.bf16.msra.mxu1 %v2563_v9  ;;  %2568 = vmatprep.subr.bf16.mxu0 %v2567_v14  ;;  %v79_v23 = vmul.f32 0.0625, %v47_v21  ;;  %v50_v27 = vld [vmem:[%s3852_s1 + $0x30] sm:$0xff]  ;;  %v2969_v30 = vld [vmem:[%s3851_s0 + $0x40] sm:$0xff]  ;;  %v80_v31 = vmul.f32 0.0625, %v48_v25  ;;  %v81_v32 = vmul.f32 0.0625, %v49_v26  ;;  %v2980_v34 = vld [vmem:[%s3851_s0 + $0x58] sm:$0xff] }
   0x7   :  { %1841 = vmax.xlane.f32.xlu0 %v1840_v10  ;;  %1847 = vmax.xlane.f32.xlu1 %v1846_v11  ;;  %v2575_v33 = vpack.c.bf16 %v2949_v22, %v2969_v30  ;;  %v51_v35 = vld [vmem:[%s3852_s1 + $0x38] sm:$0xff]  ;;  %v2988_v36 = vld [vmem:[%s3851_s0 + $0x50] sm:$0xff]  ;;  %v82_v37 = vmul.f32 0.0625, %v50_v27  ;;  %v52_v38 = vld [vmem:[%s3852_s1 + $0x40] sm:$0xff]  ;;  %v1861_v54 = vsel %vm108_vm0, %v2969_v30, -inf  ;;  %v1864_v55 = vsel %vm108_vm0, %v2949_v22, -inf }
   0x8   :  { %2451 = vmatprep.mubr.msk.f32.mxu0 %vm108_vm0, %v76_v18  ;;  %2458 = vmatprep.mubr.msk.f32.mxu1 %vm108_vm0, %v78_v20  ;;  %v2996_v39 = vld [vmem:[%s3851_s0 + $0x60] sm:$0xff]  ;;  %v53_v40 = vld [vmem:[%s3852_s1 + $0x48] sm:$0xff]  ;;  %v83_v44 = vmul.f32 0.0625, %v51_v35  ;;  %v2579_v45 = vpack.c.bf16 %v2980_v34, %v2988_v36  ;;  %v84_v46 = vmul.f32 0.0625, %v52_v38  ;;  %v54_v47 = vld [vmem:[%s3852_s1 + $0x50] sm:$0xff]  ;;  %v1867_v9 = vsel %vm108_vm0, %v2988_v36, -inf }
   0x9   :  { %2452 = vmatmul.mubr.msk.f32.vlgmr.msra.gmra.mrb[0].mxu0 %vm108_vm0, %v77_v19  ;;  %2459 = vmatmul.mubr.msk.f32.vlgmr.msra.gmra.mrb[0].mxu1 %vm108_vm0, %v79_v23  ;;  %v3004_v41 = vld [vmem:[%s3851_s0 + $0x68] sm:$0xff]  ;;  %v85_v48 = vmul.f32 0.0625, %v53_v40  ;;  %v55_v50 = vld [vmem:[%s3852_s1 + $0x58] sm:$0xff]  ;;  %v3026_v51 = vld [vmem:[%s3851_s0 + $0x70] sm:$0xff]  ;;  %v86_v56 = vmul.f32 0.0625, %v54_v47  ;;  %v1870_v10 = vsel %vm108_vm0, %v2980_v34, -inf }
   0xa   :  { %2570 = vmatpush3.bf16.msra.mxu0 %v2567_v14  ;;  %2572 = vmatprep.subr.bf16.mxu1 %v2571_v24  ;;  %v2583_v49 = vpack.c.bf16 %v3004_v41, %v2996_v39  ;;  %v3031_v52 = vld [vmem:[%s3851_s0 + $0x78] sm:$0xff]  ;;  %v56_v53 = vld [vmem:[%s3852_s1 + $0x60] sm:$0xff]  ;;  %v87_v57 = vmul.f32 0.0625, %v55_v50  ;;  %v57_v59 = vld [vmem:[%s3852_s1 + $0x68] sm:$0xff] }
   0xb   :  { %1850 = vmax.xlane.f32.xlu0 %v1849_v28  ;;  %1853 = vmax.xlane.f32.xlu1 %v1852_v29  ;;  %v2587_v58 = vpack.c.bf16 %v3031_v52, %v3026_v51  ;;  %v3050_v60 = vld [vmem:[%s3851_s0 + $0x80] sm:$0xff]  ;;  %v3055_v61 = vld [vmem:[%s3851_s0 + $0x88] sm:$0xff]  ;;  %v88_v62 = vmul.f32 0.0625, %v56_v53  ;;  %v58_v63 = vld [vmem:[%s3852_s1 + $0x70] sm:$0xff]  ;;  %v89_v11 = vmul.f32 0.0625, %v57_v59 }
   0xc   :  { %2465 = vmatprep.mubr.msk.f32.mxu0 %vm108_vm0, %v80_v31  ;;  %2574 = vmatpush3.bf16.msra.mxu1 %v2571_v24  ;;  %v59_v3 = vld [vmem:[%s3852_s1 + $0x78] sm:$0xff]  ;;  %v3067_v4 = vld [vmem:[%s3851_s0 + $0x90] sm:$0xff]  ;;  %v2591_v12 = vpack.c.bf16 %v3055_v61, %v3050_v60  ;;  %v90_v13 = vmul.f32 0.0625, %v58_v63  ;;  %v60_v14 = vld [vmem:[%s3852_s1 + $0x80] sm:$0xff] }
   0xd   :  { %2466 = vmatmul.mubr.msk.f32.vlgmr.msra.gmra.mrb[2].mxu0 %vm108_vm0, %v81_v32  ;;  %2576 = vmatprep.subr.bf16.mxu0 %v2575_v33  ;;  %v3072_v6 = vld [vmem:[%s3851_s0 + $0x98] sm:$0xff]  ;;  %v61_v15 = vld [vmem:[%s3852_s1 + $0x88] sm:$0xff]  ;;  %v91_v18 = vmul.f32 0.0625, %v59_v3  ;;  %v3094_v20 = vld [vmem:[%s3851_s0 + $0xa0] sm:$0xff] }
   0xe   :  { %2472 = vmatprep.mubr.msk.f32.mxu1 %vm108_vm0, %v82_v37  ;;  %2578 = vmatpush3.bf16.msra.mxu0 %v2575_v33  ;;  %v2595_v19 = vpack.c.bf16 %v3072_v6, %v3067_v4  ;;  %v3099_v21 = vld [vmem:[%s3851_s0 + $0xa8] sm:$0xff] }
   0xf   :  { %1856 = vmax.xlane.f32.xlu0 %v1855_v42  ;;  %1859 = vmax.xlane.f32.xlu1 %v1858_v43 }
  0x10   :  { %2473 = vmatmul.mubr.msk.f32.vlgmr.msra.gmra.mrb[2].mxu1 %vm108_vm0, %v83_v44  ;;  %2580 = vmatprep.subr.bf16.mxu1 %v2579_v45 }
  0x11   :  { %2479 = vmatprep.mubr.msk.f32.mxu0 %vm108_vm0, %v84_v46  ;;  %2582 = vmatpush3.bf16.msra.mxu1 %v2579_v45 }
  0x12   :  { %2480 = vmatmul.mubr.msk.f32.vlgmr.msra.gmra.mrb[4].mxu0 %vm108_vm0, %v85_v48  ;;  %2584 = vmatprep.subr.bf16.mxu0 %v2583_v49 }
  0x13   :  { %1862 = vmax.xlane.f32.xlu0 %v1861_v54  ;;  %1865 = vmax.xlane.f32.xlu1 %v1864_v55 }
  0x14   :  { %2486 = vmatprep.mubr.msk.f32.mxu1 %vm108_vm0, %v86_v56  ;;  %2586 = vmatpush3.bf16.msra.mxu0 %v2583_v49 }
  0x15   :  { %2487 = vmatmul.mubr.msk.f32.vlgmr.msra.gmra.mrb[4].mxu1 %vm108_vm0, %v87_v57  ;;  %2588 = vmatprep.subr.bf16.mxu1 %v2587_v58 }
  0x16   :  { %2493 = vmatprep.mubr.msk.f32.mxu0 %vm108_vm0, %v88_v62  ;;  %2590 = vmatpush3.bf16.msra.mxu1 %v2587_v58 }
  0x17   :  { %7 = vsyncpa [#allocation3], 0  ;;  %1868 = vmax.xlane.f32.xlu0 %v1867_v9  ;;  %1871 = vmax.xlane.f32.xlu1 %v1870_v10  ;;  %v62_v23 = vld [vmem:[%s3852_s1 + $0x90] sm:$0xff]  ;;  %v1873_v24 = vsel %vm108_vm0, %v2996_v39, -inf  ;;  %v1876_v25 = vsel %vm108_vm0, %v3004_v41, -inf  ;;  %v92_v26 = vmul.f32 0.0625, %v60_v14  ;;  %v2599_v28 = vpack.c.bf16 %v3099_v21, %v3094_v20 }
  0x18   :  { %2494 = vmatmul.mubr.msk.f32.vlgmr.msra.gmra.mrb[6].mxu0 %vm108_vm0, %v89_v11  ;;  %2592 = vmatprep.subr.bf16.mxu0 %v2591_v12  ;;  %v93_v27 = vmul.f32 0.0625, %v61_v15  ;;  %v63_v29 = vld [vmem:[%s3852_s1 + $0x98] sm:$0xff]  ;;  %v3118_v31 = vld [vmem:[%s3851_s0 + $0xb0] sm:$0xff]  ;;  %v94_v33 = vmul.f32 0.0625, %v62_v23  ;;  %v64_v35 = vld [vmem:[%s3852_s1 + $0xa0] sm:$0xff]  ;;  %v1879_v42 = vsel %vm108_vm0, %v3026_v51, -inf }
  0x19   :  { %2500 = vmatprep.mubr.msk.f32.mxu1 %vm108_vm0, %v90_v13  ;;  %2594 = vmatpush3.bf16.msra.mxu0 %v2591_v12  ;;  %v3123_v32 = vld [vmem:[%s3851_s0 + $0xb8] sm:$0xff]  ;;  %v65_v37 = vld [vmem:[%s3852_s1 + $0xa8] sm:$0xff]  ;;  %v3135_v38 = vld [vmem:[%s3851_s0 + $0xc0] sm:$0xff]  ;;  %v1882_v43 = vsel %vm108_vm0, %v3031_v52, -inf  ;;  %v95_v44 = vmul.f32 0.0625, %v63_v29  ;;  %v96_v46 = vmul.f32 0.0625, %v64_v35 }
  0x1a   :  { %2501 = vmatmul.mubr.msk.f32.vlgmr.msra.gmra.mrb[6].mxu1 %vm108_vm0, %v91_v18  ;;  %2596 = vmatprep.subr.bf16.mxu1 %v2595_v19  ;;  %v3140_v40 = vld [vmem:[%s3851_s0 + $0xc8] sm:$0xff]  ;;  %v2603_v45 = vpack.c.bf16 %v3123_v32, %v3118_v31  ;;  %v66_v47 = vld [vmem:[%s3852_s1 + $0xb0] sm:$0xff]  ;;  %v97_v48 = vmul.f32 0.0625, %v65_v37  ;;  %v67_v50 = vld [vmem:[%s3852_s1 + $0xb8] sm:$0xff]  ;;  %v1885_v56 = vsel %vm108_vm0, %v3050_v60, -inf  ;;  %v1888_v57 = vsel %vm108_vm0, %v3055_v61, -inf }
  0x1b   :  { %1874 = vmax.xlane.f32.xlu0 %v1873_v24  ;;  %1877 = vmax.xlane.f32.xlu1 %v1876_v25  ;;  %v2607_v49 = vpack.c.bf16 %v3140_v40, %v3135_v38  ;;  %v3162_v53 = vld [vmem:[%s3851_s0 + $0xd0] sm:$0xff]  ;;  %v3167_v54 = vld [vmem:[%s3851_s0 + $0xd8] sm:$0xff]  ;;  %v68_v55 = vld [vmem:[%s3852_s1 + $0xc0] sm:$0xff]  ;;  %v98_v58 = vmul.f32 0.0625, %v66_v47  ;;  %v99_v59 = vmul.f32 0.0625, %v67_v50  ;;  %v1891_v15 = vsel %vm108_vm0, %v3067_v4, -inf }
  0x1c   :  { %2507 = vmatprep.mubr.msk.f32.mxu0 %vm108_vm0, %v92_v26  ;;  %2598 = vmatpush3.bf16.msra.mxu1 %v2595_v19  ;;  %v2611_v62 = vpack.c.bf16 %v3167_v54, %v3162_v53  ;;  %v69_v63 = vld [vmem:[%s3852_s1 + $0xc8] sm:$0xff]  ;;  %v3186_v3 = vld [vmem:[%s3851_s0 + $0xe0] sm:$0xff]  ;;  %v100_v10 = vmul.f32 0.0625, %v68_v55  ;;  %v70_v11 = vld [vmem:[%s3852_s1 + $0xd0] sm:$0xff]  ;;  %v1894_v18 = vsel %vm108_vm0, %v3072_v6, -inf  ;;  %v1900_v35 = vsel %vm108_vm0, %v3099_v21, -inf }
  0x1d   :  { %2508 = vmatmul.mubr.msk.f32.vlgmr.msra.gmra.mrb[8].mxu0 %vm108_vm0, %v93_v27  ;;  %2600 = vmatprep.subr.bf16.mxu0 %v2599_v28  ;;  %v3191_v9 = vld [vmem:[%s3851_s0 + $0xe8] sm:$0xff]  ;;  %v71_v12 = vld [vmem:[%s3852_s1 + $0xd8] sm:$0xff]  ;;  %v3203_v13 = vld [vmem:[%s3851_s0 + $0xf0] sm:$0xff]  ;;  %v101_v19 = vmul.f32 0.0625, %v69_v63  ;;  %v102_v24 = vmul.f32 0.0625, %v70_v11  ;;  %v1915_v50 = vsel %vm108_vm0, %v3162_v53, -inf }
  0x1e   :  { %2514 = vmatprep.mubr.msk.f32.mxu1 %vm108_vm0, %v94_v33  ;;  %2602 = vmatpush3.bf16.msra.mxu0 %v2599_v28  ;;  %v3208_v14 = vld [vmem:[%s3851_s0 + $0xf8] sm:$0xff]  ;;  %v2615_v23 = vpack.c.bf16 %v3191_v9, %v3186_v3  ;;  %v72_v25 = vld [vmem:[%s3852_s1 + $0xe0] sm:$0xff]  ;;  %v103_v26 = vmul.f32 0.0625, %v71_v12  ;;  %v73_v28 = vld [vmem:[%s3852_s1 + $0xe8] sm:$0xff]  ;;  %v1897_v33 = vsel %vm108_vm0, %v3094_v20, -inf  ;;  %v1918_v55 = vsel %vm108_vm0, %v3167_v54, -inf }
  0x1f   :  { %1880 = vmax.xlane.f32.xlu0 %v1879_v42  ;;  %1883 = vmax.xlane.f32.xlu1 %v1882_v43  ;;  %v2619_v27 = vpack.c.bf16 %v3208_v14, %v3203_v13  ;;  %v74_v29 = vld [vmem:[%s3852_s1 + $0xf0] sm:$0xff]  ;;  %v104_v37 = vmul.f32 0.0625, %v72_v25  ;;  %v105_v42 = vmul.f32 0.0625, %v73_v28  ;;  %vm2294_vm1 = vcmask 122880   ;;  %s2852_s28 = scalar_lea.hbm %s3853_s2, 16 }
  0x20   :  { %2515 = vmatmul.mubr.msk.f32.vlgmr.msra.gmra.mrb[8].mxu1 %vm108_vm0, %v95_v44  ;;  %2604 = vmatprep.subr.bf16.mxu1 %v2603_v45  ;;  %v106_v43 = vmul.f32 0.0625, %v74_v29  ;;  %v75_v44 = vld [vmem:[%s3852_s1 + $0xf8] sm:$0xff]  ;;  %vm2221_vm2 = vcmask 7168   ;;  %p2853_p0 = scmp.ne.s32.totalorder %s3853_s2, %s2852_s28  ;;  %p2856_p1 = scmp.lt.u32.totalorder %s2852_s28, %s3853_s2 }
  0x21   :  { %2521 = vmatprep.mubr.msk.f32.mxu0 %vm108_vm0, %v96_v46  ;;  %2606 = vmatpush3.bf16.msra.mxu1 %v2603_v45  ;;  %v1903_v45 = vsel %vm108_vm0, %v3118_v31, -inf  ;;  %v1906_v46 = vsel %vm108_vm0, %v3123_v32, -inf  ;;  %v107_v47 = vmul.f32 0.0625, %v75_v44 }
  0x22   :  { %2522 = vmatmul.mubr.msk.f32.vlgmr.msra.gmra.mrb[10].mxu0 %vm108_vm0, %v97_v48  ;;  %2608 = vmatprep.subr.bf16.mxu0 %v2607_v49  ;;  %v1909_v48 = vsel %vm108_vm0, %v3135_v38, -inf  ;;  %p2858_p2 = pnand %p2856_p1, %p2853_p0 }
  0x23   :  { %1886 = vmax.xlane.f32.xlu0 %v1885_v56  ;;  %1889 = vmax.xlane.f32.xlu1 %v1888_v57  ;;  %v1921_v56 = vsel %vm108_vm0, %v3186_v3, -inf  ;;  %v1924_v57 = vsel %vm108_vm0, %v3191_v9, -inf }
  0x24   :  { %2528 = vmatprep.mubr.msk.f32.mxu1 %vm108_vm0, %v98_v58  ;;  %2610 = vmatpush3.bf16.msra.mxu0 %v2607_v49  ;;  %v1912_v49 = vsel %vm108_vm0, %v3140_v40, -inf  ;;  %v1927_v58 = vsel %vm108_vm0, %v3203_v13, -inf }
  0x25   :  { %2529 = vmatmul.mubr.msk.f32.vlgmr.msra.gmra.mrb[10].mxu1 %vm108_vm0, %v99_v59  ;;  %2612 = vmatprep.subr.bf16.mxu1 %v2611_v62  ;;  %v1930_v59 = vsel %vm108_vm0, %v3208_v14, -inf }
  0x26   :  { %2535 = vmatprep.mubr.msk.f32.mxu0 %vm108_vm0, %v100_v10  ;;  %2614 = vmatpush3.bf16.msra.mxu1 %v2611_v62 }
  0x27   :  { %1892 = vmax.xlane.f32.xlu0 %v1891_v15  ;;  %1895 = vmax.xlane.f32.xlu1 %v1894_v18 }
  0x28   :  { %2536 = vmatmul.mubr.msk.f32.vlgmr.msra.gmra.mrb[12].mxu0 %vm108_vm0, %v101_v19  ;;  %2616 = vmatprep.subr.bf16.mxu0 %v2615_v23 }
  0x29   :  { %2542 = vmatprep.mubr.msk.f32.mxu1 %vm108_vm0, %v102_v24  ;;  %2618 = vmatpush3.bf16.msra.mxu0 %v2615_v23 }
  0x2a   :  { %2543 = vmatmul.mubr.msk.f32.vlgmr.msra.gmra.mrb[12].mxu1 %vm108_vm0, %v103_v26  ;;  %2620 = vmatprep.subr.bf16.mxu1 %v2619_v27 }
  0x2b   :  { %1898 = vmax.xlane.f32.xlu0 %v1897_v33  ;;  %1901 = vmax.xlane.f32.xlu1 %v1900_v35 }
  0x2c   :  { %2549 = vmatprep.mubr.msk.f32.mxu0 %vm108_vm0, %v104_v37  ;;  %2622 = vmatpush3.bf16.msra.mxu1 %v2619_v27 }
  0x2d   :  { %2550 = vmatmul.mubr.msk.f32.vlgmr.msra.gmra.mrb[14].mxu0 %vm108_vm0, %v105_v42  ;;  %2556 = vmatprep.mubr.msk.f32.mxu1 %vm108_vm0, %v106_v43 }
  0x2f   :  { %1904 = vmax.xlane.f32.xlu0 %v1903_v45  ;;  %1907 = vmax.xlane.f32.xlu1 %v1906_v46 }
  0x30   :  { %2557 = vmatmul.mubr.msk.f32.vlgmr.msra.gmra.mrb[14].mxu1 %vm108_vm0, %v107_v47 }
  0x33   :  { %1910 = vmax.xlane.f32.xlu0 %v1909_v48  ;;  %1913 = vmax.xlane.f32.xlu1 %v1912_v49 }
  0x37   :  { %1916 = vmax.xlane.f32.xlu0 %v1915_v50  ;;  %1919 = vmax.xlane.f32.xlu1 %v1918_v55 }
  0x3b   :  { %1922 = vmax.xlane.f32.xlu0 %v1921_v56  ;;  %1925 = vmax.xlane.f32.xlu1 %v1924_v57 }
  0x3f   :  { %1928 = vmax.xlane.f32.xlu0 %v1927_v58  ;;  %1931 = vmax.xlane.f32.xlu1 %v1930_v59 }
  0x90   :  { %v3264_v62 = vpop.xlane.xlu0 %1838  ;;  %v3266_v63 = vpop.xlane.xlu1 %1844 }
  0x91   :  { %v1933_v10 = vsub.f32 %v2883_v0, %v3264_v62  ;;  %v1935_v11 = vsub.f32 %v2888_v1, %v3266_v63 }
  0x93   :  { %v1965_v12 = vmul.f32 1.442695, %v1933_v10  ;;  %v1969_v15 = vmul.f32 1.442695, %v1935_v11 }
  0x94   :  { %v3272_v18 = vpop.xlane.xlu0 %1841  ;;  %v3274_v19 = vpop.xlane.xlu1 %1847 }
  0x95   :  { %2628 = vpow2.f32 %v1965_v12  ;;  %v1934_v23 = vsub.f32 %v2893_v2, %v3272_v18  ;;  %v1936_v24 = vsub.f32 %v2902_v5, %v3274_v19 }
  0x96   :  { %2630 = vpow2.f32 %v1969_v15 }
  0x97   :  { %v1967_v25 = vmul.f32 1.442695, %v1934_v23  ;;  %v1971_v26 = vmul.f32 1.442695, %v1936_v24 }
  0x98   :  { %v3280_v0 = vpop.xlane.xlu0 %1850  ;;  %v3282_v27 = vpop.xlane.xlu1 %1853 }
  0x99   :  { %2632 = vpow2.f32 %v1967_v25  ;;  %v1937_v1 = vsub.f32 %v2909_v7, %v3280_v0  ;;  %v1938_v28 = vsub.f32 %v2914_v8, %v3282_v27 }
  0x9a   :  { %2634 = vpow2.f32 %v1971_v26 }
  0x9b   :  { %v1973_v29 = vmul.f32 1.442695, %v1937_v1  ;;  %v1975_v2 = vmul.f32 1.442695, %v1938_v28 }
  0x9c   :  { %v3288_v33 = vpop.xlane.xlu0 %1856  ;;  %v3290_v5 = vpop.xlane.xlu1 %1859 }
  0x9d   :  { %2636 = vpow2.f32 %v1973_v29  ;;  %v1939_v35 = vsub.f32 %v2936_v16, %v3288_v33  ;;  %v1940_v37 = vsub.f32 %v2941_v17, %v3290_v5 }
  0x9e   :  { %2638 = vpow2.f32 %v1975_v2 }
  0x9f   :  { %v2629_v42 = vpop.eup %2628  ;;  %v1977_v7 = vmul.f32 1.442695, %v1939_v35  ;;  %v1979_v43 = vmul.f32 1.442695, %v1940_v37 }
  0xa0   :  { %v2631_v44 = vpop.eup %2630  ;;  %v3296_v8 = vpop.xlane.xlu0 %1862  ;;  %v2029_v45 = vsel %vm108_vm0, %v2629_v42, 0.0 }
  0xa1   :  { %3878 = vst [vmem:[#allocation5_spill] sm:$0xff] %v3296_v8  ;;  %v3299_v46 = vpop.xlane.xlu1 %1865  ;;  %2640 = vpow2.f32 %v1977_v7  ;;  %v1941_v47 = vsub.f32 %v2969_v30, %v3296_v8  ;;  %2030 = vadd.xlane.f32.xlu0 %v2029_v45  ;;  %v2035_v17 = vsel %vm108_vm0, %v2631_v44, 0.0 }
  0xa2   :  { %3879 = vst [vmem:[#allocation6_spill] sm:$0xff] %v3299_v46  ;;  %v1942_v16 = vsub.f32 %v2949_v22, %v3299_v46  ;;  %2642 = vpow2.f32 %v1979_v43 }
  0xa3   :  { %v2633_v48 = vpop.eup %2632  ;;  %v1981_v49 = vmul.f32 1.442695, %v1941_v47 }
  0xa4   :  { %v1983_v50 = vmul.f32 1.442695, %v1942_v16  ;;  %v2635_v55 = vpop.eup %2634  ;;  %v3306_v56 = vpop.xlane.xlu0 %1868  ;;  %v2032_v57 = vsel %vm108_vm0, %v2633_v48, 0.0 }
  0xa5   :  { %3880 = vst [vmem:[#allocation7_spill] sm:$0xff] %v3306_v56  ;;  %v3309_v58 = vpop.xlane.xlu1 %1871  ;;  %2644 = vpow2.f32 %v1981_v49  ;;  %v1943_v30 = vsub.f32 %v2988_v36, %v3306_v56  ;;  %2036 = vadd.xlane.f32.xlu0 %v2035_v17  ;;  %2033 = vadd.xlane.f32.xlu1 %v2032_v57  ;;  %v2038_v59 = vsel %vm108_vm0, %v2635_v55, 0.0 }
  0xa6   :  { %3881 = vst [vmem:[#allocation8_spill] sm:$0xff] %v3309_v58  ;;  %v1944_v22 = vsub.f32 %v2980_v34, %v3309_v58  ;;  %2646 = vpow2.f32 %v1983_v50 }
  0xa7   :  { %v2637_v10 = vpop.eup %2636  ;;  %v1985_v11 = vmul.f32 1.442695, %v1943_v30 }
  0xa8   :  { %v1987_v12 = vmul.f32 1.442695, %v1944_v22  ;;  %v2639_v15 = vpop.eup %2638  ;;  %v3316_v23 = vpop.xlane.xlu0 %1874  ;;  %v2041_v24 = vsel %vm108_vm0, %v2637_v10, 0.0 }
  0xa9   :  { %3882 = vst [vmem:[#allocation9_spill] sm:$0xff] %v3316_v23  ;;  %v3319_v25 = vpop.xlane.xlu1 %1877  ;;  %2648 = vpow2.f32 %v1985_v11  ;;  %v1945_v36 = vsub.f32 %v2996_v39, %v3316_v23  ;;  %2039 = vadd.xlane.f32.xlu1 %v2038_v59  ;;  %2042 = vadd.xlane.f32.xlu0 %v2041_v24  ;;  %v2044_v26 = vsel %vm108_vm0, %v2639_v15, 0.0 }
  0xaa   :  { %3883 = vst [vmem:[#allocation10_spill] sm:$0xff] %v3319_v25  ;;  %v1946_v34 = vsub.f32 %v3004_v41, %v3319_v25  ;;  %2650 = vpow2.f32 %v1987_v12 }
  0xab   :  { %v2641_v1 = vpop.eup %2640  ;;  %v1989_v28 = vmul.f32 1.442695, %v1945_v36 }
  0xac   :  { %v1991_v29 = vmul.f32 1.442695, %v1946_v34  ;;  %v2643_v2 = vpop.eup %2642  ;;  %v3326_v35 = vpop.xlane.xlu0 %1880  ;;  %v2047_v37 = vsel %vm108_vm0, %v2641_v1, 0.0 }
  0xad   :  { %3884 = vst [vmem:[#allocation11_spill] sm:$0xff] %v3326_v35  ;;  %v3329_v42 = vpop.xlane.xlu1 %1883  ;;  %2652 = vpow2.f32 %v1989_v28  ;;  %v1947_v39 = vsub.f32 %v3026_v51, %v3326_v35  ;;  %2045 = vadd.xlane.f32.xlu1 %v2044_v26  ;;  %2048 = vadd.xlane.f32.xlu0 %v2047_v37  ;;  %v2050_v7 = vsel %vm108_vm0, %v2643_v2, 0.0 }
  0xae   :  { %3885 = vst [vmem:[#allocation12_spill] sm:$0xff] %v3329_v42  ;;  %v1948_v41 = vsub.f32 %v3031_v52, %v3329_v42  ;;  %2654 = vpow2.f32 %v1991_v29 }
  0xaf   :  { %v2645_v43 = vpop.eup %2644  ;;  %v1993_v44 = vmul.f32 1.442695, %v1947_v39 }
  0xb0   :  { %v1995_v45 = vmul.f32 1.442695, %v1948_v41  ;;  %v2647_v47 = vpop.eup %2646  ;;  %v3336_v16 = vpop.xlane.xlu0 %1886  ;;  %v2053_v17 = vsel %vm108_vm0, %v2645_v43, 0.0 }
  0xb1   :  { %3886 = vst [vmem:[#allocation13_spill] sm:$0xff] %v3336_v16  ;;  %v3339_v48 = vpop.xlane.xlu1 %1889  ;;  %2656 = vpow2.f32 %v1993_v44  ;;  %v1949_v51 = vsub.f32 %v3050_v60, %v3336_v16  ;;  %2051 = vadd.xlane.f32.xlu1 %v2050_v7  ;;  %2054 = vadd.xlane.f32.xlu0 %v2053_v17  ;;  %v2056_v49 = vsel %vm108_vm0, %v2647_v47, 0.0 }
  0xb2   :  { %3887 = vst [vmem:[#allocation14_spill] sm:$0xff] %v3339_v48  ;;  %v1950_v52 = vsub.f32 %v3055_v61, %v3339_v48  ;;  %2658 = vpow2.f32 %v1995_v45 }
  0xb3   :  { %v2649_v50 = vpop.eup %2648  ;;  %v1997_v55 = vmul.f32 1.442695, %v1949_v51 }
  0xb4   :  { %v1999_v57 = vmul.f32 1.442695, %v1950_v52  ;;  %v2651_v30 = vpop.eup %2650  ;;  %v3346_v22 = vpop.xlane.xlu0 %1892  ;;  %v2059_v59 = vsel %vm108_vm0, %v2649_v50, 0.0 }
  0xb5   :  { %3888 = vst [vmem:[#allocation15_spill] sm:$0xff] %v3346_v22  ;;  %v3349_v10 = vpop.xlane.xlu1 %1895  ;;  %2660 = vpow2.f32 %v1997_v55  ;;  %v1951_v60 = vsub.f32 %v3067_v4, %v3346_v22  ;;  %2057 = vadd.xlane.f32.xlu1 %v2056_v49  ;;  %2060 = vadd.xlane.f32.xlu0 %v2059_v59  ;;  %v2062_v11 = vsel %vm108_vm0, %v2651_v30, 0.0 }
  0xb6   :  { %3889 = vst [vmem:[#allocation16_spill] sm:$0xff] %v3349_v10  ;;  %v1952_v61 = vsub.f32 %v3072_v6, %v3349_v10  ;;  %2662 = vpow2.f32 %v1999_v57 }
  0xb7   :  { %v2653_v12 = vpop.eup %2652  ;;  %v2001_v15 = vmul.f32 1.442695, %v1951_v60 }
  0xb8   :  { %v2003_v24 = vmul.f32 1.442695, %v1952_v61  ;;  %v2655_v36 = vpop.eup %2654  ;;  %v3356_v34 = vpop.xlane.xlu0 %1898  ;;  %v2065_v26 = vsel %vm108_vm0, %v2653_v12, 0.0 }
  0xb9   :  { %3890 = vst [vmem:[#allocation17_spill] sm:$0xff] %v3356_v34  ;;  %v3359_v1 = vpop.xlane.xlu1 %1901  ;;  %2664 = vpow2.f32 %v2001_v15  ;;  %v1953_v4 = vsub.f32 %v3094_v20, %v3356_v34  ;;  %2063 = vadd.xlane.f32.xlu1 %v2062_v11  ;;  %2066 = vadd.xlane.f32.xlu0 %v2065_v26  ;;  %v2068_v28 = vsel %vm108_vm0, %v2655_v36, 0.0 }
  0xba   :  { %3891 = vst [vmem:[#allocation18_spill] sm:$0xff] %v3359_v1  ;;  %v1954_v6 = vsub.f32 %v3099_v21, %v3359_v1  ;;  %2666 = vpow2.f32 %v2003_v24 }
  0xbb   :  { %v2657_v29 = vpop.eup %2656  ;;  %v2005_v2 = vmul.f32 1.442695, %v1953_v4 }
  0xbc   :  { %v2007_v37 = vmul.f32 1.442695, %v1954_v6  ;;  %v2659_v39 = vpop.eup %2658  ;;  %v3366_v41 = vpop.xlane.xlu0 %1904  ;;  %v2071_v7 = vsel %vm108_vm0, %v2657_v29, 0.0 }
  0xbd   :  { %3892 = vst [vmem:[#allocation19_spill] sm:$0xff] %v3366_v41  ;;  %v3369_v43 = vpop.xlane.xlu1 %1907  ;;  %2668 = vpow2.f32 %v2005_v2  ;;  %v1955_v20 = vsub.f32 %v3118_v31, %v3366_v41  ;;  %2069 = vadd.xlane.f32.xlu1 %v2068_v28  ;;  %2072 = vadd.xlane.f32.xlu0 %v2071_v7  ;;  %v2074_v44 = vsel %vm108_vm0, %v2659_v39, 0.0 }
  0xbe   :  { %3893 = vst [vmem:[#allocation20_spill] sm:$0xff] %v3369_v43  ;;  %v1956_v21 = vsub.f32 %v3123_v32, %v3369_v43  ;;  %2670 = vpow2.f32 %v2007_v37 }
  0xbf   :  { %v2661_v45 = vpop.eup %2660  ;;  %v2009_v47 = vmul.f32 1.442695, %v1955_v20 }
  0xc0   :  { %v2011_v17 = vmul.f32 1.442695, %v1956_v21  ;;  %v2663_v51 = vpop.eup %2662  ;;  %v3376_v52 = vpop.xlane.xlu0 %1910  ;;  %v2077_v49 = vsel %vm108_vm0, %v2661_v45, 0.0 }
  0xc1   :  { %3894 = vst [vmem:[#allocation21_spill] sm:$0xff] %v3376_v52  ;;  %v3379_v50 = vpop.xlane.xlu1 %1913  ;;  %2672 = vpow2.f32 %v2009_v47  ;;  %v1957_v31 = vsub.f32 %v3135_v38, %v3376_v52  ;;  %2075 = vadd.xlane.f32.xlu1 %v2074_v44  ;;  %2078 = vadd.xlane.f32.xlu0 %v2077_v49  ;;  %v2080_v55 = vsel %vm108_vm0, %v2663_v51, 0.0 }
  0xc2   :  { %3895 = vst [vmem:[#allocation22_spill] sm:$0xff] %v3379_v50  ;;  %v1958_v32 = vsub.f32 %v3140_v40, %v3379_v50  ;;  %2674 = vpow2.f32 %v2011_v17 }
  0xc3   :  { %v2665_v57 = vpop.eup %2664  ;;  %v2013_v30 = vmul.f32 1.442695, %v1957_v31 }
  0xc4   :  { %v2015_v59 = vmul.f32 1.442695, %v1958_v32  ;;  %v2667_v60 = vpop.eup %2666  ;;  %v3386_v61 = vpop.xlane.xlu0 %1916  ;;  %v2083_v11 = vsel %vm108_vm0, %v2665_v57, 0.0 }
  0xc5   :  { %3896 = vst [vmem:[#allocation23_spill] sm:$0xff] %v3386_v61  ;;  %v3389_v12 = vpop.xlane.xlu1 %1919  ;;  %2676 = vpow2.f32 %v2013_v30  ;;  %v1959_v38 = vsub.f32 %v3162_v53, %v3386_v61  ;;  %2081 = vadd.xlane.f32.xlu1 %v2080_v55  ;;  %2084 = vadd.xlane.f32.xlu0 %v2083_v11  ;;  %v2086_v15 = vsel %vm108_vm0, %v2667_v60, 0.0 }
  0xc6   :  { %3897 = vst [vmem:[#allocation24_spill] sm:$0xff] %v3389_v12  ;;  %v1960_v40 = vsub.f32 %v3167_v54, %v3389_v12  ;;  %2678 = vpow2.f32 %v2015_v59 }
  0xc7   :  { %v2669_v24 = vpop.eup %2668  ;;  %v2017_v36 = vmul.f32 1.442695, %v1959_v38 }
  0xc8   :  { %v2019_v26 = vmul.f32 1.442695, %v1960_v40  ;;  %v2671_v4 = vpop.eup %2670  ;;  %v3396_v6 = vpop.xlane.xlu0 %1922  ;;  %v2089_v28 = vsel %vm108_vm0, %v2669_v24, 0.0 }
  0xc9   :  { %3898 = vst [vmem:[#allocation25_spill] sm:$0xff] %v3396_v6  ;;  %v3399_v29 = vpop.xlane.xlu1 %1925  ;;  %2680 = vpow2.f32 %v2017_v36  ;;  %v1961_v53 = vsub.f32 %v3186_v3, %v3396_v6  ;;  %2087 = vadd.xlane.f32.xlu1 %v2086_v15  ;;  %2090 = vadd.xlane.f32.xlu0 %v2089_v28  ;;  %v2092_v2 = vsel %vm108_vm0, %v2671_v4, 0.0 }
  0xca   :  { %3899 = vst [vmem:[#allocation26_spill] sm:$0xff] %v3399_v29  ;;  %v1962_v54 = vsub.f32 %v3191_v9, %v3399_v29  ;;  %2682 = vpow2.f32 %v2019_v26 }
  0xcb   :  { %v2673_v37 = vpop.eup %2672  ;;  %v2021_v39 = vmul.f32 1.442695, %v1961_v53 }
  0xcc   :  { %v2023_v7 = vmul.f32 1.442695, %v1962_v54  ;;  %v2675_v20 = vpop.eup %2674  ;;  %v3406_v21 = vpop.xlane.xlu0 %1928  ;;  %v2095_v44 = vsel %vm108_vm0, %v2673_v37, 0.0 }
  0xcd   :  { %3900 = vst [vmem:[#allocation27_spill] sm:$0xff] %v3406_v21  ;;  %v3409_v45 = vpop.xlane.xlu1 %1931  ;;  %2684 = vpow2.f32 %v2021_v39  ;;  %v1963_v3 = vsub.f32 %v3203_v13, %v3406_v21  ;;  %2093 = vadd.xlane.f32.xlu1 %v2092_v2  ;;  %2096 = vadd.xlane.f32.xlu0 %v2095_v44  ;;  %v2098_v47 = vsel %vm108_vm0, %v2675_v20, 0.0 }
  0xce   :  { %3901 = vst [vmem:[#allocation28_spill] sm:$0xff] %v3409_v45  ;;  %v1964_v9 = vsub.f32 %v3208_v14, %v3409_v45  ;;  %2686 = vpow2.f32 %v2023_v7 }
  0xcf   :  { %v2677_v17 = vpop.eup %2676  ;;  %v2025_v51 = vmul.f32 1.442695, %v1963_v3 }
  0xd0   :  { %v2027_v49 = vmul.f32 1.442695, %v1964_v9  ;;  %v2679_v31 = vpop.eup %2678  ;;  %v2101_v32 = vsel %vm108_vm0, %v2677_v17, 0.0 }
  0xd1   :  { %2688 = vpow2.f32 %v2025_v51  ;;  %2099 = vadd.xlane.f32.xlu1 %v2098_v47  ;;  %2102 = vadd.xlane.f32.xlu0 %v2101_v32  ;;  %v2104_v13 = vsel %vm108_vm0, %v2679_v31, 0.0 }
  0xd2   :  { %2690 = vpow2.f32 %v2027_v49 }
  0xd3   :  { %v2681_v55 = vpop.eup %2680 }
  0xd4   :  { %v2683_v57 = vpop.eup %2682  ;;  %v2107_v30 = vsel %vm108_vm0, %v2681_v55, 0.0 }
  0xd5   :  { %2105 = vadd.xlane.f32.xlu1 %v2104_v13  ;;  %2108 = vadd.xlane.f32.xlu0 %v2107_v30  ;;  %v2110_v14 = vsel %vm108_vm0, %v2683_v57, 0.0 }
  0xd7   :  { %v2685_v59 = vpop.eup %2684 }
  0xd8   :  { %v2687_v60 = vpop.eup %2686  ;;  %v2113_v11 = vsel %vm108_vm0, %v2685_v59, 0.0 }
  0xd9   :  { %2111 = vadd.xlane.f32.xlu1 %v2110_v14  ;;  %2114 = vadd.xlane.f32.xlu0 %v2113_v11  ;;  %v2116_v38 = vsel %vm108_vm0, %v2687_v60, 0.0 }
  0xdb   :  { %v2689_v40 = vpop.eup %2688 }
  0xdc   :  { %v2691_v15 = vpop.eup %2690  ;;  %v2119_v24 = vsel %vm108_vm0, %v2689_v40, 0.0  ;;  %v3423_v36 = vpop.f32.mrb[0].mxu0 }
  0xdd   :  { %v3425_v26 = vpop.f32.mrb[0].mxu1  ;;  %2117 = vadd.xlane.f32.xlu1 %v2116_v38  ;;  %2120 = vadd.xlane.f32.xlu0 %v2119_v24  ;;  %v1406_v4 = vsel %vm108_vm0, %v3423_v36, -inf  ;;  %v181_v53 = vpop.f32.mrb[1].mxu0  ;;  %v2122_v2 = vsel %vm108_vm0, %v2691_v15, 0.0 }
  0xde   :  { %v1415_v28 = vsel %vm108_vm0, %v3425_v26, -inf  ;;  %v3431_v54 = vpop.f32.mrb[1].mxu1  ;;  %v1405_v37 = vsel %vm108_vm0, %v181_v53, -inf }
  0xdf   :  { %v1414_v39 = vsel %vm108_vm0, %v3431_v54, -inf  ;;  %v1407_v7 = vmax.f32 %v1405_v37, %v1406_v4 }
  0xe0   :  { %v1416_v20 = vmax.f32 %v1414_v39, %v1415_v28  ;;  %v3437_v44 = vpop.f32.mrb[2].mxu0 }
  0xe1   :  { %2123 = vadd.xlane.f32.xlu1 %v2122_v2  ;;  %v1408_v3 = vrot.slane %v1407_v7, 4  ;;  %v1424_v47 = vsel %vm108_vm0, %v3437_v44, -inf  ;;  %v3441_v17 = vpop.f32.mrb[3].mxu0 }
  0xe2   :  { %v1417_v9 = vrot.slane %v1416_v20, 4  ;;  %v1423_v51 = vsel %vm108_vm0, %v3441_v17, -inf }
  0xe3   :  { %v1409_v49 = vmax.f32 %v1407_v7, %v1408_v3  ;;  %v1425_v32 = vmax.f32 %v1423_v51, %v1424_v47  ;;  %v3445_v13 = vpop.f32.mrb[2].mxu1 }
  0xe4   :  { %v1418_v31 = vmax.f32 %v1416_v20, %v1417_v9  ;;  %v1433_v55 = vsel %vm108_vm0, %v3445_v13, -inf  ;;  %v3449_v57 = vpop.f32.mrb[3].mxu1 }
  0xe5   :  { %v1410_v30 = vrot.slane %v1409_v49, 2  ;;  %v1426_v59 = vrot.slane %v1425_v32, 4  ;;  %v1432_v60 = vsel %vm108_vm0, %v3449_v57, -inf  ;;  %v3453_v11 = vpop.f32.mrb[4].mxu0 }
  0xe6   :  { %v1419_v14 = vrot.slane %v1418_v31, 2  ;;  %v1434_v38 = vmax.f32 %v1432_v60, %v1433_v55  ;;  %v1442_v40 = vsel %vm108_vm0, %v3453_v11, -inf  ;;  %v3457_v15 = vpop.f32.mrb[5].mxu0 }
  0xe7   :  { %v1411_v24 = vmax.f32 %v1409_v49, %v1410_v30  ;;  %v1427_v28 = vmax.f32 %v1425_v32, %v1426_v59  ;;  %v1441_v2 = vsel %vm108_vm0, %v3457_v15, -inf }
  0xe8   :  { %v1420_v4 = vmax.f32 %v1418_v31, %v1419_v14  ;;  %v1435_v37 = vrot.slane %v1434_v38, 4  ;;  %v1443_v39 = vmax.f32 %v1441_v2, %v1442_v40  ;;  %v3461_v7 = vpop.f32.mrb[4].mxu1 }
  0xe9   :  { %v1412_v20 = vrot.slane %v1411_v24, 1  ;;  %v1428_v9 = vrot.slane %v1427_v28, 2  ;;  %v1451_v47 = vsel %vm108_vm0, %v3461_v7, -inf  ;;  %v3465_v51 = vpop.f32.mrb[5].mxu1 }
  0xea   :  { %v1421_v3 = vrot.slane %v1420_v4, 1  ;;  %v1436_v55 = vmax.f32 %v1434_v38, %v1435_v37  ;;  %v1444_v60 = vrot.slane %v1443_v39, 4  ;;  %v1450_v49 = vsel %vm108_vm0, %v3465_v51, -inf }
  0xeb   :  { %v3469_v31 = vmax.f32 %v1411_v24, %v1412_v20  ;;  %v1429_v30 = vmax.f32 %v1427_v28, %v1428_v9  ;;  %v1452_v14 = vmax.f32 %v1450_v49, %v1451_v47  ;;  %v3473_v59 = vpop.f32.mrb[6].mxu0 }
  0xec   :  { %v3471_v32 = vmax.f32 %v1420_v4, %v1421_v3  ;;  %v1437_v40 = vrot.slane %v1436_v55, 2  ;;  %v1445_v2 = vmax.f32 %v1443_v39, %v1444_v60  ;;  %v1460_v45 = vsel %vm108_vm0, %v3473_v59, -inf  ;;  %v3477_v21 = vpop.f32.mrb[7].mxu0 }
  0xed   :  { %v1549_v38 = vsub.f32 %v181_v53, %v3469_v31  ;;  %v1550_v37 = vsub.f32 %v3423_v36, %v3469_v31  ;;  %v3486_v28 = vpop.f32.mrb[6].mxu1  ;;  %v1430_v20 = vrot.slane %v1429_v30, 1  ;;  %v1453_v9 = vrot.slane %v1452_v14, 4 }
  0xee   :  { %v1551_v24 = vsub.f32 %v3431_v54, %v3471_v32  ;;  %v1552_v4 = vsub.f32 %v3425_v26, %v3471_v32  ;;  %v1438_v39 = vmax.f32 %v1436_v55, %v1437_v40  ;;  %v1446_v3 = vrot.slane %v1445_v2, 2  ;;  %v3488_v47 = vpop.f32.mrb[7].mxu1 }
  0xef   :  { %v1581_v60 = vmul.f32 1.442695, %v1549_v38  ;;  %v1583_v49 = vmul.f32 1.442695, %v1550_v37  ;;  %v3490_v6 = vmax.f32 %v1429_v30, %v1430_v20  ;;  %v1454_v26 = vmax.f32 %v1452_v14, %v1453_v9 }
  0xf0   :  { %v1585_v53 = vmul.f32 1.442695, %v1551_v24  ;;  %v1587_v29 = vmul.f32 1.442695, %v1552_v4  ;;  %v1439_v36 = vrot.slane %v1438_v39, 1  ;;  %v1447_v12 = vmax.f32 %v1445_v2, %v1446_v3  ;;  %v3492_v54 = vpop.f32.mrb[8].mxu0 }
  0xf1   :  { %2692 = vpow2.f32 %v1581_v60  ;;  %v1459_v61 = vsel %vm108_vm0, %v3477_v21, -inf  ;;  %v1469_v55 = vsel %vm108_vm0, %v3486_v28, -inf  ;;  %v3498_v40 = vpop.f32.mrb[9].mxu0  ;;  %v1553_v38 = vsub.f32 %v3441_v17, %v3490_v6 }
  0xf2   :  { %2694 = vpow2.f32 %v1583_v49  ;;  %v1554_v30 = vsub.f32 %v3437_v44, %v3490_v6  ;;  %v3504_v2 = vmax.f32 %v1438_v39, %v1439_v36  ;;  %v1448_v37 = vrot.slane %v1447_v12, 1 }
  0xf3   :  { %2696 = vpow2.f32 %v1585_v53  ;;  %v1455_v14 = vrot.slane %v1454_v26, 2  ;;  %v1461_v24 = vmax.f32 %v1459_v61, %v1460_v45  ;;  %v3506_v4 = vpop.f32.mrb[8].mxu1  ;;  %v1589_v20 = vmul.f32 1.442695, %v1553_v38 }
  0xf4   :  { %2698 = vpow2.f32 %v1587_v29  ;;  %v1591_v3 = vmul.f32 1.442695, %v1554_v30  ;;  %v1555_v9 = vsub.f32 %v3449_v57, %v3504_v2  ;;  %v3510_v60 = vpop.f32.mrb[9].mxu1  ;;  %v1556_v17 = vsub.f32 %v3445_v13, %v3504_v2 }
  0xf5   :  { %v3514_v44 = vmax.f32 %v1447_v12, %v1448_v37  ;;  %v1456_v39 = vmax.f32 %v1454_v26, %v1455_v14  ;;  %v1462_v49 = vrot.slane %v1461_v24, 4  ;;  %v3516_v53 = vpop.f32.mrb[10].mxu0  ;;  %2700 = vpow2.f32 %v1589_v20 }
  0xf6   :  { %v1593_v61 = vmul.f32 1.442695, %v1555_v9  ;;  %v1468_v29 = vsel %vm108_vm0, %v3488_v47, -inf  ;;  %v1478_v45 = vsel %vm108_vm0, %v3492_v54, -inf  ;;  %v3522_v57 = vpop.f32.mrb[11].mxu0  ;;  %2702 = vpow2.f32 %v1591_v3 }
  0xf7   :  { %v1595_v36 = vmul.f32 1.442695, %v1556_v17  ;;  %v1557_v12 = vsub.f32 %v3457_v15, %v3514_v44  ;;  %v1558_v13 = vsub.f32 %v3453_v11, %v3514_v44  ;;  %v1457_v26 = vrot.slane %v1456_v39, 1 }
  0xf8   :  { %2704 = vpow2.f32 %v1593_v61  ;;  %v1463_v38 = vmax.f32 %v1461_v24, %v1462_v49  ;;  %v1470_v30 = vmax.f32 %v1468_v29, %v1469_v55  ;;  %v3528_v37 = vpop.f32.mrb[10].mxu1  ;;  %v1477_v9 = vsel %vm108_vm0, %v3498_v40, -inf }
  0xf9   :  { %2706 = vpow2.f32 %v1595_v36  ;;  %v1597_v14 = vmul.f32 1.442695, %v1557_v12  ;;  %v1599_v20 = vmul.f32 1.442695, %v1558_v13  ;;  %v3532_v3 = vpop.f32.mrb[11].mxu1  ;;  %v3534_v17 = vmax.f32 %v1456_v39, %v1457_v26 }
  0xfa   :  { %v1464_v15 = vrot.slane %v1463_v38, 2  ;;  %v1471_v50 = vrot.slane %v1470_v30, 4  ;;  %v1479_v52 = vmax.f32 %v1477_v9, %v1478_v45  ;;  %v1487_v55 = vsel %vm108_vm0, %v3506_v4, -inf }
  0xfb   :  { %v2693_v11 = vpop.eup %2692  ;;  %2708 = vpow2.f32 %v1597_v14  ;;  %v1486_v24 = vsel %vm108_vm0, %v3510_v60, -inf  ;;  %v3542_v49 = vsel %vm108_vm0, %v3516_v53, -inf  ;;  %v3544_v61 = vpop.f32.mrb[12].mxu0  ;;  %v1559_v45 = vsub.f32 %v3465_v51, %v3534_v17 }
  0xfc   :  { %v2695_v29 = vpop.eup %2694  ;;  %v1645_v39 = vsel %vm108_vm0, %v2693_v11, 0.0  ;;  %2710 = vpow2.f32 %v1599_v20  ;;  %v1560_v36 = vsub.f32 %v3461_v7, %v3534_v17  ;;  %v3551_v12 = vpop.f32.mrb[13].mxu0  ;;  %v1465_v14 = vmax.f32 %v1463_v38, %v1464_v15 }
  0xfd   :  { %v2697_v13 = vpop.eup %2696  ;;  %v1646_v26 = vsel %vm108_vm0, %v2695_v29, 0.0  ;;  %v1472_v9 = vmax.f32 %v1470_v30, %v1471_v50  ;;  %v1480_v43 = vrot.slane %v1479_v52, 4  ;;  %v3554_v41 = vpop.f32.mrb[12].mxu1  ;;  %v1601_v11 = vmul.f32 1.442695, %v1559_v45 }
  0xfe   :  { %v2699_v1 = vpop.eup %2698  ;;  %v1647_v34 = vadd.f32 %v1646_v26, %v1645_v39  ;;  %v1654_v20 = vsel %vm108_vm0, %v2697_v13, 0.0  ;;  %v1603_v10 = vmul.f32 1.442695, %v1560_v36  ;;  %v3557_v51 = vpop.f32.mrb[13].mxu1  ;;  %v1466_v22 = vrot.slane %v1465_v14, 1 }
  0xff   :  { %v1655_v7 = vsel %vm108_vm0, %v2699_v1, 0.0  ;;  %v1473_v48 = vrot.slane %v1472_v9, 2  ;;  %v1481_v16 = vmax.f32 %v1479_v52, %v1480_v43  ;;  %v2701_v42 = vpop.eup %2700  ;;  %2712 = vpow2.f32 %v1601_v11 }
 0x100   :  { %v1648_v29 = vrot.slane %v1647_v34, 4  ;;  %v1656_v38 = vadd.f32 %v1655_v7, %v1654_v20  ;;  %v3560_v50 = vmax.f32 %v1486_v24, %v1487_v55  ;;  %v3562_v30 = vpop.f32.mrb[14].mxu0  ;;  %v2703_v15 = vpop.eup %2702  ;;  %v1663_v39 = vsel %vm108_vm0, %v2701_v42, 0.0 }
 0x101   :  { %2714 = vpow2.f32 %v1603_v10  ;;  %v3565_v45 = vmax.f32 %v1465_v14, %v1466_v22  ;;  %v1474_v36 = vmax.f32 %v1472_v9, %v1473_v48  ;;  %v3567_v13 = vpop.f32.mrb[15].mxu0  ;;  %v1664_v52 = vsel %vm108_vm0, %v2703_v15, 0.0 }
 0x102   :  { %v2705_v1 = vpop.eup %2704  ;;  %v1649_v26 = vadd.f32 %v1648_v29, %v1647_v34  ;;  %v1657_v43 = vrot.slane %v1656_v38, 4  ;;  %v1482_v20 = vrot.slane %v1481_v16, 2  ;;  %v1665_v55 = vadd.f32 %v1664_v52, %v1663_v39 }
 0x103   :  { %v2707_v11 = vpop.eup %2706  ;;  %v1672_v24 = vsel %vm108_vm0, %v2705_v1, 0.0  ;;  %v1561_v7 = vsub.f32 %v3477_v21, %v3565_v45  ;;  %v1562_v42 = vsub.f32 %v3473_v59, %v3565_v45  ;;  %v3575_v22 = vpop.f32.mrb[14].mxu1  ;;  %v1475_v14 = vrot.slane %v1474_v36, 1 }
 0x104   :  { %v1650_v48 = vrot.slane %v1649_v26, 2  ;;  %v1658_v10 = vadd.f32 %v1657_v43, %v1656_v38  ;;  %v1673_v34 = vsel %vm108_vm0, %v2707_v11, 0.0  ;;  %v3578_v9 = vpop.f32.mrb[15].mxu1  ;;  %v1666_v15 = vrot.slane %v1665_v55, 4 }
 0x105   :  { %v2709_v29 = vpop.eup %2708  ;;  %v1674_v39 = vadd.f32 %v1673_v34, %v1672_v24  ;;  %v1605_v52 = vmul.f32 1.442695, %v1561_v7  ;;  %v1607_v1 = vmul.f32 1.442695, %v1562_v42  ;;  %v3581_v59 = vmax.f32 %v1474_v36, %v1475_v14 }
 0x106   :  { %v2711_v35 = vpop.eup %2710  ;;  %v1651_v25 = vadd.f32 %v1650_v48, %v1649_v26  ;;  %v1659_v21 = vrot.slane %v1658_v10, 2  ;;  %v1681_v23 = vsel %vm108_vm0, %v2709_v29, 0.0  ;;  %v1667_v58 = vadd.f32 %v1666_v15, %v1665_v55 }
 0x107   :  { %v1675_v56 = vrot.slane %v1674_v39, 4  ;;  %v1682_v38 = vsel %vm108_vm0, %v2711_v35, 0.0  ;;  %2716 = vpow2.f32 %v1605_v52  ;;  %v1563_v7 = vsub.f32 %v3488_v47, %v3581_v59 }
 0x108   :  { %v1652_v43 = vrot.slane %v1651_v25, 1  ;;  %v1660_v11 = vadd.f32 %v1659_v21, %v1658_v10  ;;  %v1683_v46 = vadd.f32 %v1682_v38, %v1681_v23  ;;  %2718 = vpow2.f32 %v1607_v1 }
 0x109   :  { %v1668_v8 = vrot.slane %v1667_v58, 2  ;;  %v1676_v24 = vadd.f32 %v1675_v56, %v1674_v39  ;;  %v1564_v26 = vsub.f32 %v3486_v28, %v3581_v59  ;;  %v2713_v42 = vpop.eup %2712  ;;  %v1483_v34 = vmax.f32 %v1481_v16, %v1482_v20 }
 0x10a   :  { %v1653_v36 = vadd.f32 %v1652_v43, %v1651_v25  ;;  %v1661_v48 = vrot.slane %v1660_v11, 1  ;;  %v1684_v55 = vrot.slane %v1683_v46, 4  ;;  %v1690_v10 = vsel %vm108_vm0, %v2713_v42, 0.0 }
 0x10b   :  { %v2715_v14 = vpop.eup %2714  ;;  %v1669_v35 = vadd.f32 %v1668_v8, %v1667_v58  ;;  %v1677_v29 = vrot.slane %v1676_v24, 2  ;;  %v1609_v23 = vmul.f32 1.442695, %v1563_v7  ;;  %v1611_v28 = vmul.f32 1.442695, %v1564_v26 }
 0x10c   :  { %2720 = vlog2.f32 %v1653_v36  ;;  %v1662_v15 = vadd.f32 %v1661_v48, %v1660_v11  ;;  %v1685_v56 = vadd.f32 %v1684_v55, %v1683_v46  ;;  %v1691_v39 = vsel %vm108_vm0, %v2715_v14, 0.0 }
 0x10d   :  { %v1670_v47 = vrot.slane %v1669_v35, 1  ;;  %v1678_v52 = vadd.f32 %v1677_v29, %v1676_v24  ;;  %v1692_v1 = vadd.f32 %v1691_v39, %v1690_v10  ;;  %2722 = vpow2.f32 %v1609_v23 }
 0x10e   :  { %2724 = vlog2.f32 %v1662_v15  ;;  %v1686_v25 = vrot.slane %v1685_v56, 2  ;;  %v1484_v21 = vrot.slane %v1483_v34, 1  ;;  %v1489_v58 = vrot.slane %v3560_v50, 4 }
 0x10f   :  { %v1671_v16 = vadd.f32 %v1670_v47, %v1669_v35  ;;  %v1679_v20 = vrot.slane %v1678_v52, 1  ;;  %v1693_v8 = vrot.slane %v1692_v1, 4  ;;  %2726 = vpow2.f32 %v1611_v28 }
 0x110   :  { %v1687_v38 = vadd.f32 %v1686_v25, %v1685_v56  ;;  %v3591_v43 = vmax.f32 %v1483_v34, %v1484_v21  ;;  %v1495_v46 = vsel %vm108_vm0, %v3522_v57, -inf  ;;  %v1490_v26 = vmax.f32 %v3560_v50, %v1489_v58 }
 0x111   :  { %v2717_v11 = vpop.eup %2716  ;;  %2728 = vlog2.f32 %v1671_v16  ;;  %v1680_v24 = vadd.f32 %v1679_v20, %v1678_v52  ;;  %v1694_v7 = vadd.f32 %v1693_v8, %v1692_v1  ;;  %v1497_v47 = vmax.f32 %v1495_v46, %v3542_v49 }
 0x112   :  { %v2719_v42 = vpop.eup %2718  ;;  %v1688_v36 = vrot.slane %v1687_v38, 1  ;;  %v1699_v48 = vsel %vm108_vm0, %v2717_v11, 0.0  ;;  %v1565_v55 = vsub.f32 %v3498_v40, %v3591_v43  ;;  %v1566_v34 = vsub.f32 %v3492_v54, %v3591_v43 }
 0x113   :  { %2730 = vlog2.f32 %v1680_v24  ;;  %v1695_v14 = vrot.slane %v1694_v7, 2  ;;  %v1700_v35 = vsel %vm108_vm0, %v2719_v42, 0.0  ;;  %v1491_v29 = vrot.slane %v1490_v26, 2 }
 0x114   :  { %v1689_v10 = vadd.f32 %v1688_v36, %v1687_v38  ;;  %v1701_v23 = vadd.f32 %v1700_v35, %v1699_v48  ;;  %v1613_v15 = vmul.f32 1.442695, %v1565_v55  ;;  %v1615_v56 = vmul.f32 1.442695, %v1566_v34 }
 0x115   :  { %v1696_v50 = vadd.f32 %v1695_v14, %v1694_v7  ;;  %v1492_v39 = vmax.f32 %v1490_v26, %v1491_v29  ;;  %v1505_v52 = vsel %vm108_vm0, %v3528_v37, -inf  ;;  %v1504_v54 = vsel %vm108_vm0, %v3532_v3, -inf }
 0x116   :  { %v2721_v40 = vpop.eup %2720  ;;  %2732 = vlog2.f32 %v1689_v10  ;;  %v1702_v1 = vrot.slane %v1701_v23, 4  ;;  %v3609_v25 = vsel %vm108_vm0, %v3544_v61, -inf  ;;  %v1498_v38 = vrot.slane %v1497_v47, 4 }
 0x117   :  { %v2723_v28 = vpop.eup %2722  ;;  %v1790_v21 = vmul.f32 0.6931472, %v2721_v40  ;;  %v1697_v16 = vrot.slane %v1696_v50, 1  ;;  %2734 = vpow2.f32 %v1613_v15  ;;  %v1493_v20 = vrot.slane %v1492_v39, 1 }
 0x118   :  { %v2725_v8 = vpop.eup %2724  ;;  %v1703_v49 = vadd.f32 %v1702_v1, %v1701_v23  ;;  %v1708_v58 = vsel %vm108_vm0, %v2723_v28, 0.0  ;;  %2736 = vpow2.f32 %v1615_v56  ;;  %v1499_v36 = vmax.f32 %v1497_v47, %v1498_v38 }
 0x119   :  { %v1821_v46 = vadd.f32 %v1790_v21, %v3469_v31  ;;  %v1792_v11 = vmul.f32 0.6931472, %v2725_v8  ;;  %v1698_v24 = vadd.f32 %v1697_v16, %v1696_v50  ;;  %v3613_v7 = vmax.f32 %v1492_v39, %v1493_v20  ;;  %v2727_v26 = vpop.eup %2726 }
 0x11a   :  { %v1704_v42 = vrot.slane %v1703_v49, 2  ;;  %v1506_v48 = vmax.f32 %v1504_v54, %v1505_v52  ;;  %v1513_v55 = vsel %vm108_vm0, %v3551_v12, -inf  ;;  %v1709_v29 = vsel %vm108_vm0, %v2727_v26, 0.0 }
 0x11b   :  { %v2729_v34 = vpop.eup %2728  ;;  %v2295_v14 = vsel %vm2294_vm1, %v1821_v46, 0.0  ;;  %v1822_v35 = vadd.f32 %v1792_v11, %v3471_v32  ;;  %2738 = vlog2.f32 %v1698_v24  ;;  %v1710_v23 = vadd.f32 %v1709_v29, %v1708_v58 }
 0x11c   :  { %v1794_v31 = vmul.f32 0.6931472, %v2729_v34  ;;  %v1705_v10 = vadd.f32 %v1704_v42, %v1703_v49  ;;  %v1567_v15 = vsub.f32 %v3510_v60, %v3613_v7  ;;  %v1568_v39 = vsub.f32 %v3506_v4, %v3613_v7 }
 0x11d   :  { %v2731_v56 = vpop.eup %2730  ;;  %v2296_v50 = vsel %vm2294_vm1, %v1822_v35, 0.0  ;;  %v1500_v47 = vrot.slane %v1499_v36, 2  ;;  %v1507_v52 = vrot.slane %v1506_v48, 4  ;;  %v1711_v28 = vrot.slane %v1710_v23, 4 }
 0x11e   :  { %v2297_v40 = vadd.f32 %v2296_v50, %v2295_v14  ;;  %v1823_v32 = vadd.f32 %v1794_v31, %v3490_v6  ;;  %v1796_v1 = vmul.f32 0.6931472, %v2731_v56  ;;  %v1706_v54 = vrot.slane %v1705_v10, 1 }
 0x11f   :  { %v1617_v21 = vmul.f32 1.442695, %v1567_v15  ;;  %v1619_v16 = vmul.f32 1.442695, %v1568_v39  ;;  %v1501_v20 = vmax.f32 %v1499_v36, %v1500_v47  ;;  %v1508_v38 = vmax.f32 %v1506_v48, %v1507_v52 }
 0x120   :  { %v2733_v8 = vpop.eup %2732  ;;  %v2298_v60 = vsel %vm2294_vm1, %v1823_v32, 0.0  ;;  %v1824_v49 = vadd.f32 %v1796_v1, %v3504_v2  ;;  %v1707_v58 = vadd.f32 %v1706_v54, %v1705_v10  ;;  %v1712_v24 = vadd.f32 %v1711_v28, %v1710_v23 }
 0x121   :  { %v2735_v46 = vpop.eup %2734  ;;  %v2299_v4 = vadd.f32 %v2298_v60, %v2297_v40  ;;  %v1798_v11 = vmul.f32 0.6931472, %v2733_v8  ;;  %2740 = vpow2.f32 %v1617_v21  ;;  %v1502_v34 = vrot.slane %v1501_v20, 1 }
 0x122   :  { %v2737_v26 = vpop.eup %2736  ;;  %v2300_v6 = vsel %vm2294_vm1, %v1824_v49, 0.0  ;;  %2742 = vlog2.f32 %v1707_v58  ;;  %v1717_v42 = vsel %vm108_vm0, %v2735_v46, 0.0  ;;  %v1713_v35 = vrot.slane %v1712_v24, 2 }
 0x123   :  { %v2301_v36 = vadd.f32 %v2300_v6, %v2299_v4  ;;  %v1825_v14 = vadd.f32 %v1798_v11, %v3514_v44  ;;  %v1718_v2 = vsel %vm108_vm0, %v2737_v26, 0.0  ;;  %2744 = vpow2.f32 %v1619_v16 }
 0x124   :  { %v1719_v29 = vadd.f32 %v1718_v2, %v1717_v42  ;;  %v3632_v48 = vmax.f32 %v1501_v20, %v1502_v34  ;;  %v1509_v31 = vrot.slane %v1508_v38, 2  ;;  %v1714_v15 = vadd.f32 %v1713_v35, %v1712_v24 }
 0x125   :  { %v2739_v10 = vpop.eup %2738  ;;  %v2302_v23 = vsel %vm2294_vm1, %v1825_v14, 0.0  ;;  %v1515_v56 = vmax.f32 %v1513_v55, %v3609_v25  ;;  %v1523_v50 = vsel %vm108_vm0, %v3554_v41, -inf  ;;  %v1522_v25 = vsel %vm108_vm0, %v3557_v51, -inf }
 0x126   :  { %v2303_v39 = vadd.f32 %v2302_v23, %v2301_v36  ;;  %v1800_v47 = vmul.f32 0.6931472, %v2739_v10  ;;  %v1720_v44 = vrot.slane %v1719_v29, 4  ;;  %v1569_v52 = vsub.f32 %v3522_v57, %v3632_v48 }
 0x127   :  { %v1715_v40 = vrot.slane %v1714_v15, 1  ;;  %v1570_v32 = vsub.f32 %v3516_v53, %v3632_v48  ;;  %v1510_v1 = vmax.f32 %v1508_v38, %v1509_v31  ;;  %v1516_v54 = vrot.slane %v1515_v56, 4 }
 0x128   :  { %v1826_v28 = vadd.f32 %v1800_v47, %v3534_v17  ;;  %v1721_v21 = vadd.f32 %v1720_v44, %v1719_v29  ;;  %v1621_v16 = vmul.f32 1.442695, %v1569_v52  ;;  %v1524_v58 = vmax.f32 %v1522_v25, %v1523_v50 }
 0x129   :  { %v1716_v55 = vadd.f32 %v1715_v40, %v1714_v15  ;;  %v1623_v20 = vmul.f32 1.442695, %v1570_v32  ;;  %v1511_v8 = vrot.slane %v1510_v1, 1  ;;  %v1517_v60 = vmax.f32 %v1515_v56, %v1516_v54 }
 0x12a   :  { %v2304_v49 = vsel %vm2294_vm1, %v1826_v28, 0.0  ;;  %v1722_v57 = vrot.slane %v1721_v21, 2  ;;  %2746 = vpow2.f32 %v1621_v16  ;;  %v1525_v26 = vrot.slane %v1524_v58, 4 }
 0x12b   :  { %v2741_v46 = vpop.eup %2740  ;;  %v2305_v53 = vadd.f32 %v2304_v49, %v2303_v39  ;;  %2748 = vlog2.f32 %v1716_v55  ;;  %v3646_v38 = vmax.f32 %v1510_v1, %v1511_v8  ;;  %v1518_v17 = vrot.slane %v1517_v60, 2 }
 0x12c   :  { %v2743_v4 = vpop.eup %2742  ;;  %v1723_v11 = vadd.f32 %v1722_v57, %v1721_v21  ;;  %v1726_v24 = vsel %vm108_vm0, %v2741_v46, 0.0  ;;  %2750 = vpow2.f32 %v1623_v20  ;;  %v1526_v2 = vmax.f32 %v1524_v58, %v1525_v26 }
 0x12d   :  { %v1802_v6 = vmul.f32 0.6931472, %v2743_v4  ;;  %v1571_v42 = vsub.f32 %v3532_v3, %v3646_v38  ;;  %v1572_v34 = vsub.f32 %v3528_v37, %v3646_v38  ;;  %v1519_v36 = vmax.f32 %v1517_v60, %v1518_v17  ;;  %v2745_v14 = vpop.eup %2744 }
 0x12e   :  { %v1724_v35 = vrot.slane %v1723_v11, 1  ;;  %v1532_v29 = vsel %vm108_vm0, %v3562_v30, -inf  ;;  %v1531_v31 = vsel %vm108_vm0, %v3567_v13, -inf  ;;  %v2031_v10 = vpop.xlane.xlu0 %2030  ;;  %v1727_v15 = vsel %vm108_vm0, %v2745_v14, 0.0 }
 0x12f   :  { %v1827_v23 = vadd.f32 %v1802_v6, %v3565_v45  ;;  %v1625_v56 = vmul.f32 1.442695, %v1571_v42  ;;  %v1627_v3 = vmul.f32 1.442695, %v1572_v34  ;;  %v1728_v39 = vadd.f32 %v1727_v15, %v1726_v24 }
 0x130   :  { %v1725_v50 = vadd.f32 %v1724_v35, %v1723_v11  ;;  %v1520_v37 = vrot.slane %v1519_v36, 1  ;;  %v1527_v47 = vrot.slane %v1526_v2, 2  ;;  %v1533_v52 = vmax.f32 %v1531_v31, %v1532_v29 }
 0x131   :  { %v2306_v44 = vsel %vm2294_vm1, %v1827_v23, 0.0  ;;  %2752 = vpow2.f32 %v1625_v56  ;;  %v1541_v40 = vsel %vm108_vm0, %v3575_v22, -inf  ;;  %v1729_v1 = vrot.slane %v1728_v39, 4 }
 0x132   :  { %v2307_v32 = vadd.f32 %v2306_v44, %v2305_v53  ;;  %2754 = vlog2.f32 %v1725_v50  ;;  %v3662_v54 = vmax.f32 %v1519_v36, %v1520_v37  ;;  %v3664_v45 = vpop.xlane.xlu1 %2033  ;;  %v3666_v28 = vpop.xlane.xlu0 %2036  ;;  %v1528_v21 = vmax.f32 %v1526_v2, %v1527_v47 }
 0x133   :  { %2756 = vpow2.f32 %v1627_v3  ;;  %v1534_v16 = vrot.slane %v1533_v52, 4  ;;  %v1540_v25 = vsel %vm108_vm0, %v3578_v9, -inf  ;;  %v1730_v20 = vadd.f32 %v1729_v1, %v1728_v39 }
 0x134   :  { %v2747_v55 = vpop.eup %2746  ;;  %v1573_v8 = vsub.f32 %v3551_v12, %v3662_v54  ;;  %v1574_v60 = vsub.f32 %v3544_v61, %v3662_v54  ;;  %v1542_v49 = vmax.f32 %v1540_v25, %v1541_v40  ;;  %v1529_v46 = vrot.slane %v1528_v21, 1 }
 0x135   :  { %v2749_v57 = vpop.eup %2748  ;;  %v1735_v58 = vsel %vm108_vm0, %v2747_v55, 0.0  ;;  %v1535_v53 = vmax.f32 %v1533_v52, %v1534_v16  ;;  %2758 = vlog2.f32 %v2031_v10  ;;  %v1731_v11 = vrot.slane %v1730_v20, 2 }
 0x136   :  { %v2751_v17 = vpop.eup %2750  ;;  %v1804_v4 = vmul.f32 0.6931472, %v2749_v57  ;;  %v1629_v24 = vmul.f32 1.442695, %v1573_v8  ;;  %v1543_v26 = vrot.slane %v1542_v49, 4  ;;  %v3675_v6 = vpop.xlane.xlu1 %2039  ;;  %v3680_v61 = vmax.f32 %v1528_v21, %v1529_v46 }
 0x137   :  { %v3677_v42 = vpop.xlane.xlu0 %2042  ;;  %v1736_v12 = vsel %vm108_vm0, %v2751_v17, 0.0  ;;  %v1631_v34 = vmul.f32 1.442695, %v1574_v60  ;;  %v1536_v36 = vrot.slane %v1535_v53, 2  ;;  %v1732_v35 = vadd.f32 %v1731_v11, %v1730_v20 }
 0x138   :  { %v1828_v14 = vadd.f32 %v1804_v4, %v3581_v59  ;;  %v1737_v2 = vadd.f32 %v1736_v12, %v1735_v58  ;;  %2760 = vpow2.f32 %v1629_v24  ;;  %v1575_v29 = vsub.f32 %v3557_v51, %v3680_v61 }
 0x139   :  { %2762 = vpow2.f32 %v1631_v34  ;;  %v1576_v31 = vsub.f32 %v3554_v41, %v3680_v61  ;;  %v1537_v10 = vmax.f32 %v1535_v53, %v1536_v36  ;;  %v1733_v15 = vrot.slane %v1732_v35, 1 }
 0x13a   :  { %v2308_v23 = vsel %vm2294_vm1, %v1828_v14, 0.0  ;;  %v1738_v56 = vrot.slane %v1737_v2, 4  ;;  %v1544_v3 = vmax.f32 %v1542_v49, %v1543_v26  ;;  %v3688_v50 = vpop.xlane.xlu1 %2045  ;;  %v1633_v47 = vmul.f32 1.442695, %v1575_v29 }
 0x13b   :  { %v3690_v39 = vpop.xlane.xlu0 %2048  ;;  %v2753_v59 = vpop.eup %2752  ;;  %v2309_v37 = vadd.f32 %v2308_v23, %v2307_v32  ;;  %v1635_v44 = vmul.f32 1.442695, %v1576_v31  ;;  %v1538_v52 = vrot.slane %v1537_v10, 1  ;;  %v1734_v51 = vadd.f32 %v1733_v15, %v1732_v35 }
 0x13c   :  { %v2755_v40 = vpop.eup %2754  ;;  %v1739_v1 = vadd.f32 %v1738_v56, %v1737_v2  ;;  %v1744_v41 = vsel %vm108_vm0, %v2753_v59, 0.0  ;;  %v1545_v21 = vrot.slane %v1544_v3, 2  ;;  %2764 = vpow2.f32 %v1633_v47 }
 0x13d   :  { %v2757_v16 = vpop.eup %2756  ;;  %v1806_v25 = vmul.f32 0.6931472, %v2755_v40  ;;  %v3693_v55 = vmax.f32 %v1537_v10, %v1538_v52  ;;  %2766 = vlog2.f32 %v1734_v51 }
 0x13e   :  { %v1740_v20 = vrot.slane %v1739_v1, 2  ;;  %v1745_v8 = vsel %vm108_vm0, %v2757_v16, 0.0  ;;  %v1546_v60 = vmax.f32 %v1544_v3, %v1545_v21  ;;  %v3696_v32 = vpop.xlane.xlu1 %2051  ;;  %2768 = vpow2.f32 %v1635_v44 }
 0x13f   :  { %v3698_v49 = vpop.xlane.xlu0 %2054  ;;  %v2759_v57 = vpop.eup %2758  ;;  %v1829_v58 = vadd.f32 %v1806_v25, %v3591_v43  ;;  %v1746_v46 = vadd.f32 %v1745_v8, %v1744_v41  ;;  %v1577_v53 = vsub.f32 %v3567_v13, %v3693_v55  ;;  %v1578_v4 = vsub.f32 %v3562_v30, %v3693_v55 }
 0x140   :  { %v1741_v17 = vadd.f32 %v1740_v20, %v1739_v1  ;;  %v1547_v11 = vrot.slane %v1546_v60, 1  ;;  %2770 = vlog2.f32 %v3664_v45  ;;  %v2126_v41 = vmul.f32 0.6931472, %v2759_v57 }
 0x141   :  { %v2310_v24 = vsel %vm2294_vm1, %v1829_v58, 0.0  ;;  %v1747_v26 = vrot.slane %v1746_v46, 4  ;;  %v1637_v12 = vmul.f32 1.442695, %v1577_v53  ;;  %v1639_v43 = vmul.f32 1.442695, %v1578_v4 }
 0x142   :  { %v2761_v34 = vpop.eup %2760  ;;  %v2311_v36 = vadd.f32 %v2310_v24, %v2309_v37  ;;  %v1742_v14 = vrot.slane %v1741_v17, 1  ;;  %v3707_v35 = vmax.f32 %v1546_v60, %v1547_v11  ;;  %v3709_v2 = vpop.xlane.xlu1 %2057  ;;  %v2189_v57 = vadd.f32 %v2126_v41, %v3264_v62 }
 0x143   :  { %v3711_v13 = vpop.xlane.xlu0 %2060  ;;  %v2763_v29 = vpop.eup %2762  ;;  %v1748_v31 = vadd.f32 %v1747_v26, %v1746_v46  ;;  %v1753_v30 = vsel %vm108_vm0, %v2761_v34, 0.0  ;;  %2772 = vpow2.f32 %v1637_v12 }
 0x144   :  { %v1743_v10 = vadd.f32 %v1742_v14, %v1741_v17  ;;  %v1754_v23 = vsel %vm108_vm0, %v2763_v29, 0.0  ;;  %2774 = vpow2.f32 %v1639_v43  ;;  %v1579_v45 = vsub.f32 %v3578_v9, %v3707_v35 }
 0x145   :  { %v1749_v15 = vrot.slane %v1748_v31, 2  ;;  %v1755_v56 = vadd.f32 %v1754_v23, %v1753_v30  ;;  %v1580_v3 = vsub.f32 %v3575_v22, %v3707_v35 }
 0x146   :  { %2776 = vlog2.f32 %v1743_v10  ;;  %v1641_v59 = vmul.f32 1.442695, %v1579_v45  ;;  %v3719_v37 = vpop.xlane.xlu1 %2063  ;;  %v2765_v44 = vpop.eup %2764 }
 0x147   :  { %v3721_v47 = vpop.xlane.xlu0 %2066  ;;  %v1750_v52 = vadd.f32 %v1749_v15, %v1748_v31  ;;  %v1756_v40 = vrot.slane %v1755_v56, 4  ;;  %v1643_v51 = vmul.f32 1.442695, %v1580_v3  ;;  %2778 = vlog2.f32 %v3666_v28  ;;  %v2767_v1 = vpop.eup %2766 }
 0x148   :  { %v1762_v9 = vsel %vm108_vm0, %v2765_v44, 0.0  ;;  %2780 = vpow2.f32 %v1641_v59  ;;  %v2769_v21 = vpop.eup %2768  ;;  %v1808_v16 = vmul.f32 0.6931472, %v2767_v1 }
 0x149   :  { %v1751_v22 = vrot.slane %v1750_v52, 1  ;;  %v1757_v25 = vadd.f32 %v1756_v40, %v1755_v56  ;;  %2782 = vpow2.f32 %v1643_v51  ;;  %v1763_v20 = vsel %vm108_vm0, %v2769_v21, 0.0 }
 0x14a   :  { %2784 = vlog2.f32 %v3675_v6  ;;  %v3727_v8 = vpop.xlane.xlu1 %2069  ;;  %v2771_v60 = vpop.eup %2770  ;;  %v1830_v58 = vadd.f32 %v1808_v16, %v3613_v7  ;;  %v1764_v53 = vadd.f32 %v1763_v20, %v1762_v9 }
 0x14b   :  { %v1752_v28 = vadd.f32 %v1751_v22, %v1750_v52  ;;  %v1758_v46 = vrot.slane %v1757_v25, 2  ;;  %v2128_v17 = vmul.f32 0.6931472, %v2771_v60  ;;  %2786 = vlog2.f32 %v3677_v42  ;;  %v3732_v4 = vpop.xlane.xlu0 %2072 }
 0x14c   :  { %v2312_v24 = vsel %vm2294_vm1, %v1830_v58, 0.0  ;;  %v1765_v6 = vrot.slane %v1764_v53, 4 }
 0x14d   :  { %v2773_v11 = vpop.eup %2772  ;;  %2788 = vlog2.f32 %v1752_v28  ;;  %v1759_v26 = vadd.f32 %v1758_v46, %v1757_v25  ;;  %v2190_v34 = vadd.f32 %v2128_v17, %v3272_v18  ;;  %v2313_v14 = vadd.f32 %v2312_v24, %v2311_v36 }
 0x14e   :  { %v2775_v12 = vpop.eup %2774  ;;  %v1771_v7 = vsel %vm108_vm0, %v2773_v11, 0.0  ;;  %2790 = vlog2.f32 %v3688_v50  ;;  %v3738_v62 = vpop.xlane.xlu1 %2075  ;;  %v1766_v43 = vadd.f32 %v1765_v6, %v1764_v53  ;;  %v2222_v18 = vsel %vm2221_vm2, %v2189_v57, 0.0 }
 0x14f   :  { %v1772_v42 = vsel %vm108_vm0, %v2775_v12, 0.0  ;;  %2792 = vlog2.f32 %v3690_v39  ;;  %v1760_v29 = vrot.slane %v1759_v26, 1  ;;  %v2223_v10 = vsel %vm2221_vm2, %v2190_v34, 0.0  ;;  %v3747_v3 = vpop.xlane.xlu0 %2078 }
 0x150   :  { %v2777_v31 = vpop.eup %2776  ;;  %v1773_v30 = vadd.f32 %v1772_v42, %v1771_v7  ;;  %2794 = vlog2.f32 %v3696_v32  ;;  %v1767_v39 = vrot.slane %v1766_v43, 2  ;;  %v2224_v52 = vadd.f32 %v2223_v10, %v2222_v18 }
 0x151   :  { %v2779_v23 = vpop.eup %2778  ;;  %v1810_v45 = vmul.f32 0.6931472, %v2777_v31  ;;  %2796 = vlog2.f32 %v3698_v49  ;;  %v1761_v50 = vadd.f32 %v1760_v29, %v1759_v26 }
 0x152   :  { %v2781_v36 = vpop.eup %2780  ;;  %v1774_v15 = vrot.slane %v1773_v30, 4  ;;  %v2130_v56 = vmul.f32 0.6931472, %v2779_v23  ;;  %2798 = vlog2.f32 %v3709_v2  ;;  %v3752_v40 = vpop.xlane.xlu1 %2081  ;;  %v1768_v21 = vadd.f32 %v1767_v39, %v1766_v43 }
 0x153   :  { %v2783_v59 = vpop.eup %2782  ;;  %v1831_v44 = vadd.f32 %v1810_v45, %v3632_v48  ;;  %v1780_v32 = vsel %vm108_vm0, %v2781_v36, 0.0  ;;  %2800 = vlog2.f32 %v3711_v13  ;;  %v3760_v17 = vpop.xlane.xlu0 %2084 }
 0x154   :  { %v2785_v49 = vpop.eup %2784  ;;  %v1775_v51 = vadd.f32 %v1774_v15, %v1773_v30  ;;  %v1781_v1 = vsel %vm108_vm0, %v2783_v59, 0.0  ;;  %v2191_v9 = vadd.f32 %v2130_v56, %v3266_v63  ;;  %2802 = vlog2.f32 %v3719_v37 }
 0x155   :  { %v1782_v2 = vadd.f32 %v1781_v1, %v1780_v32  ;;  %v2132_v41 = vmul.f32 0.6931472, %v2785_v49  ;;  %v2787_v16 = vpop.eup %2786  ;;  %2804 = vlog2.f32 %v1761_v50  ;;  %v2314_v13 = vsel %vm2294_vm1, %v1831_v44, 0.0  ;;  %v3902_v44 = vld [vmem:[#allocation5_spill] sm:$0xff]  ;;  %v3903_v1 = vld [vmem:[#allocation6_spill] sm:$0xff] }
 0x156   :  { %v2225_v48 = vsel %vm2221_vm2, %v2191_v9, 0.0  ;;  %v1776_v22 = vrot.slane %v1775_v51, 2  ;;  %v2134_v28 = vmul.f32 0.6931472, %v2787_v16  ;;  %v1769_v53 = vrot.slane %v1768_v21, 1  ;;  %v3764_v7 = vpop.xlane.xlu1 %2087 }
 0x157   :  { %v2789_v25 = vpop.eup %2788  ;;  %v1783_v20 = vrot.slane %v1782_v2, 4  ;;  %v2226_v60 = vadd.f32 %v2225_v48, %v2224_v52  ;;  %v2192_v58 = vadd.f32 %v2132_v41, %v3274_v19  ;;  %v2315_v57 = vadd.f32 %v2314_v13, %v2313_v14  ;;  %v2091_v49 = vpop.xlane.xlu0 %2090 }
 0x158   :  { %v2791_v46 = vpop.eup %2790  ;;  %v1812_v63 = vmul.f32 0.6931472, %v2789_v25  ;;  %v1777_v37 = vadd.f32 %v1776_v22, %v1775_v51  ;;  %v2193_v6 = vadd.f32 %v2134_v28, %v3280_v0  ;;  %2806 = vlog2.f32 %v3721_v47 }
 0x159   :  { %v2793_v11 = vpop.eup %2792  ;;  %v2227_v24 = vsel %vm2221_vm2, %v2192_v58, 0.0  ;;  %v2136_v26 = vmul.f32 0.6931472, %v2791_v46  ;;  %v1784_v12 = vadd.f32 %v1783_v20, %v1782_v2  ;;  %v1770_v47 = vadd.f32 %v1769_v53, %v1768_v21  ;;  %v3904_v20 = vld [vmem:[#allocation7_spill] sm:$0xff] }
 0x15a   :  { %v2795_v34 = vpop.eup %2794  ;;  %v1832_v19 = vadd.f32 %v1812_v63, %v3646_v38  ;;  %v2228_v43 = vadd.f32 %v2227_v24, %v2226_v60  ;;  %v2138_v42 = vmul.f32 0.6931472, %v2793_v11  ;;  %v2229_v14 = vsel %vm2221_vm2, %v2193_v6, 0.0  ;;  %v2094_v41 = vpop.xlane.xlu1 %2093  ;;  %v3905_v24 = vld [vmem:[#allocation8_spill] sm:$0xff] }
 0x15b   :  { %v2797_v29 = vpop.eup %2796  ;;  %v2194_v31 = vadd.f32 %v2136_v26, %v3282_v27  ;;  %v2140_v30 = vmul.f32 0.6931472, %v2795_v34  ;;  %v1778_v10 = vrot.slane %v1777_v37, 1  ;;  %v1785_v50 = vrot.slane %v1784_v12, 2  ;;  %v2097_v11 = vpop.xlane.xlu0 %2096 }
 0x15c   :  { %v2799_v23 = vpop.eup %2798  ;;  %v2230_v0 = vadd.f32 %v2229_v14, %v2228_v43  ;;  %v2195_v45 = vadd.f32 %v2138_v42, %v3288_v33  ;;  %v2142_v18 = vmul.f32 0.6931472, %v2797_v29  ;;  %2808 = vlog2.f32 %v1770_v47  ;;  %v3906_v14 = vld [vmem:[#allocation9_spill] sm:$0xff] }
 0x15d   :  { %v2801_v36 = vpop.eup %2800  ;;  %v2231_v38 = vsel %vm2221_vm2, %v2194_v31, 0.0  ;;  %v2196_v15 = vadd.f32 %v2140_v30, %v3290_v5  ;;  %v2144_v56 = vmul.f32 0.6931472, %v2799_v23  ;;  %v1779_v52 = vadd.f32 %v1778_v10, %v1777_v37 }
 0x15e   :  { %v2803_v39 = vpop.eup %2802  ;;  %v2232_v59 = vadd.f32 %v2231_v38, %v2230_v0  ;;  %v2197_v32 = vadd.f32 %v2142_v18, %v3902_v44  ;;  %v2146_v27 = vmul.f32 0.6931472, %v2801_v36  ;;  %v2233_v51 = vsel %vm2221_vm2, %v2195_v45, 0.0  ;;  %v2100_v34 = vpop.xlane.xlu1 %2099 }
 0x15f   :  { %v2235_v33 = vsel %vm2221_vm2, %v2196_v15, 0.0  ;;  %v2198_v9 = vadd.f32 %v2144_v56, %v3903_v1  ;;  %v1786_v2 = vadd.f32 %v1785_v50, %v1784_v12  ;;  %v2805_v16 = vpop.eup %2804  ;;  %v2148_v5 = vmul.f32 0.6931472, %v2803_v39  ;;  %v3907_v39 = vld [vmem:[#allocation10_spill] sm:$0xff]  ;;  %v3908_v1 = vld [vmem:[#allocation11_spill] sm:$0xff] }
 0x160   :  { %v2234_v48 = vadd.f32 %v2233_v51, %v2232_v59  ;;  %v1814_v21 = vmul.f32 0.6931472, %v2805_v16  ;;  %v2237_v25 = vsel %vm2221_vm2, %v2197_v32, 0.0  ;;  %v2199_v60 = vadd.f32 %v2146_v27, %v3904_v20 }
 0x161   :  { %v1787_v22 = vrot.slane %v1786_v2, 1  ;;  %v2239_v58 = vsel %vm2221_vm2, %v2198_v9, 0.0  ;;  %2810 = vlog2.f32 %v1779_v52  ;;  %v2316_v37 = vsel %vm2294_vm1, %v1832_v19, 0.0 }
 0x162   :  { %v2236_v13 = vadd.f32 %v2235_v33, %v2234_v48  ;;  %v1833_v46 = vadd.f32 %v1814_v21, %v3662_v54  ;;  %v2807_v63 = vpop.eup %2806  ;;  %2812 = vlog2.f32 %v3727_v8  ;;  %v2200_v6 = vadd.f32 %v2148_v5, %v3905_v24 }
 0x163   :  { %v1788_v28 = vadd.f32 %v1787_v22, %v1786_v2  ;;  %v2317_v26 = vadd.f32 %v2316_v37, %v2315_v57  ;;  %v2241_v42 = vsel %vm2221_vm2, %v2199_v60, 0.0  ;;  %v2150_v54 = vmul.f32 0.6931472, %v2807_v63  ;;  %v2103_v57 = vpop.xlane.xlu0 %2102  ;;  %v3909_v22 = vld [vmem:[#allocation12_spill] sm:$0xff] }
 0x164   :  { %v2238_v53 = vadd.f32 %v2237_v25, %v2236_v13  ;;  %v2318_v12 = vsel %vm2294_vm1, %v1833_v46, 0.0  ;;  %v2243_v8 = vsel %vm2221_vm2, %v2200_v6, 0.0  ;;  %v3910_v25 = vld [vmem:[#allocation13_spill] sm:$0xff]  ;;  %v3911_v6 = vld [vmem:[#allocation14_spill] sm:$0xff] }
 0x165   :  { %2814 = vlog2.f32 %v1788_v28  ;;  %v2319_v29 = vadd.f32 %v2318_v12, %v2317_v26  ;;  %v2201_v31 = vadd.f32 %v2150_v54, %v3906_v14  ;;  %v3912_v12 = vld [vmem:[#allocation15_spill] sm:$0xff] }
 0x166   :  { %v2240_v43 = vadd.f32 %v2239_v58, %v2238_v53  ;;  %2816 = vlog2.f32 %v3732_v4  ;;  %v2106_v4 = vpop.xlane.xlu1 %2105  ;;  %v2809_v30 = vpop.eup %2808 }
 0x167   :  { %2818 = vlog2.f32 %v3738_v62  ;;  %v1816_v62 = vmul.f32 0.6931472, %v2809_v30  ;;  %v2245_v18 = vsel %vm2221_vm2, %v2201_v31, 0.0  ;;  %v2109_v15 = vpop.xlane.xlu0 %2108 }
 0x168   :  { %v2242_v19 = vadd.f32 %v2241_v42, %v2240_v43  ;;  %2820 = vlog2.f32 %v3747_v3 }
 0x169   :  { %2822 = vlog2.f32 %v3752_v40  ;;  %v1834_v40 = vadd.f32 %v1816_v62, %v3680_v61 }
 0x16a   :  { %2824 = vlog2.f32 %v3760_v17  ;;  %v2244_v10 = vadd.f32 %v2243_v8, %v2242_v19  ;;  %v2112_v32 = vpop.xlane.xlu1 %2111 }
 0x16b   :  { %2826 = vlog2.f32 %v3764_v7  ;;  %v2811_v23 = vpop.eup %2810  ;;  %v2320_v47 = vsel %vm2294_vm1, %v1834_v40, 0.0 }
 0x16c   :  { %2828 = vlog2.f32 %v2091_v49  ;;  %v2813_v0 = vpop.eup %2812  ;;  %v1818_v3 = vmul.f32 0.6931472, %v2811_v23  ;;  %v2246_v36 = vadd.f32 %v2245_v18, %v2244_v10  ;;  %v2321_v52 = vadd.f32 %v2320_v47, %v2319_v29 }
 0x16d   :  { %2830 = vlog2.f32 %v2094_v41  ;;  %v2152_v17 = vmul.f32 0.6931472, %v2813_v0  ;;  %v3914_v0 = vld [vmem:[#allocation17_spill] sm:$0xff] }
 0x16e   :  { %2832 = vlog2.f32 %v2097_v11  ;;  %v1835_v7 = vadd.f32 %v1818_v3, %v3693_v55  ;;  %v2115_v11 = vpop.xlane.xlu0 %2114  ;;  %v2118_v43 = vpop.xlane.xlu1 %2117 }
 0x16f   :  { %v2815_v45 = vpop.eup %2814  ;;  %2834 = vlog2.f32 %v2100_v34  ;;  %v2202_v59 = vadd.f32 %v2152_v17, %v3907_v39  ;;  %v3916_v39 = vld [vmem:[#allocation19_spill] sm:$0xff] }
 0x170   :  { %v2817_v50 = vpop.eup %2816  ;;  %v1820_v38 = vmul.f32 0.6931472, %v2815_v45  ;;  %2836 = vlog2.f32 %v2103_v57  ;;  %v2322_v49 = vsel %vm2294_vm1, %v1835_v7, 0.0  ;;  %v3913_v57 = vld [vmem:[#allocation16_spill] sm:$0xff] }
 0x171   :  { %v2819_v56 = vpop.eup %2818  ;;  %v2154_v44 = vmul.f32 0.6931472, %v2817_v50  ;;  %v2247_v55 = vsel %vm2221_vm2, %v2202_v59, 0.0  ;;  %2838 = vlog2.f32 %v2106_v4  ;;  %v2323_v16 = vadd.f32 %v2322_v49, %v2321_v52  ;;  %v3915_v50 = vld [vmem:[#allocation18_spill] sm:$0xff] }
 0x172   :  { %v2821_v27 = vpop.eup %2820  ;;  %v1836_v61 = vadd.f32 %v1820_v38, %v3707_v35  ;;  %v2156_v51 = vmul.f32 0.6931472, %v2819_v56  ;;  %v2248_v5 = vadd.f32 %v2247_v55, %v2246_v36  ;;  %2840 = vlog2.f32 %v2109_v15  ;;  %v2121_v18 = vpop.xlane.xlu0 %2120 }
 0x173   :  { %v2823_v33 = vpop.eup %2822  ;;  %v2203_v9 = vadd.f32 %v2154_v44, %v3908_v1  ;;  %v2158_v2 = vmul.f32 0.6931472, %v2821_v27  ;;  %2842 = vlog2.f32 %v2112_v32  ;;  %v2124_v7 = vpop.xlane.xlu1 %2123  ;;  %v3917_v27 = vld [vmem:[#allocation20_spill] sm:$0xff] }
 0x174   :  { %v2825_v41 = vpop.eup %2824  ;;  %v2324_v48 = vsel %vm2294_vm1, %v1836_v61, 0.0  ;;  %v2204_v21 = vadd.f32 %v2156_v51, %v3909_v22  ;;  %v2160_v60 = vmul.f32 0.6931472, %v2823_v33  ;;  %2844 = vlog2.f32 %v2115_v11 }
 0x175   :  { %v2827_v13 = vpop.eup %2826  ;;  %v2249_v35 = vsel %vm2221_vm2, %v2203_v9, 0.0  ;;  %v2205_v20 = vadd.f32 %v2158_v2, %v3910_v25  ;;  %v2162_v58 = vmul.f32 0.6931472, %v2825_v41  ;;  %v2325_v46 = vadd.f32 %v2324_v48, %v2323_v16  ;;  %v3918_v16 = vld [vmem:[#allocation21_spill] sm:$0xff] }
 0x176   :  { %v2829_v28 = vpop.eup %2828  ;;  %v2250_v63 = vadd.f32 %v2249_v35, %v2248_v5  ;;  %v2251_v53 = vsel %vm2221_vm2, %v2204_v21, 0.0  ;;  %v2164_v37 = vmul.f32 0.6931472, %v2827_v13  ;;  %v2206_v26 = vadd.f32 %v2160_v60, %v3911_v6  ;;  %v3919_v5 = vld [vmem:[#allocation22_spill] sm:$0xff] }
 0x177   :  { %v2831_v24 = vpop.eup %2830  ;;  %v2207_v34 = vadd.f32 %v2162_v58, %v3912_v12  ;;  %2326 = vadd.xlane.f32.xlu1 %v2325_v46  ;;  %v2166_v54 = vmul.f32 0.6931472, %v2829_v28  ;;  %v2253_v19 = vsel %vm2221_vm2, %v2205_v20, 0.0  ;;  %2846 = vlog2.f32 %v2118_v43  ;;  %v3920_v20 = vld [vmem:[#allocation23_spill] sm:$0xff]  ;;  %v3921_v58 = vld [vmem:[#allocation24_spill] sm:$0xff]  ;;  %v3922_v43 = vld [vmem:[#allocation25_spill] sm:$0xff] }
 0x178   :  { %v2252_v42 = vadd.f32 %v2251_v53, %v2250_v63  ;;  %v2833_v29 = vpop.eup %2832  ;;  %v2255_v8 = vsel %vm2221_vm2, %v2206_v26, 0.0  ;;  %v2208_v14 = vadd.f32 %v2164_v37, %v3913_v57  ;;  %v2168_v31 = vmul.f32 0.6931472, %v2831_v24 }
 0x179   :  { %v2835_v4 = vpop.eup %2834  ;;  %v2257_v23 = vsel %vm2221_vm2, %v2207_v34, 0.0  ;;  %v2209_v3 = vadd.f32 %v2166_v54, %v3914_v0  ;;  %v2170_v45 = vmul.f32 0.6931472, %v2833_v29  ;;  %2848 = vlog2.f32 %v2121_v18  ;;  %v3923_v54 = vld [vmem:[#allocation26_spill] sm:$0xff] }
 0x17a   :  { %v2254_v30 = vadd.f32 %v2253_v19, %v2252_v42  ;;  %v2837_v10 = vpop.eup %2836  ;;  %v2259_v17 = vsel %vm2221_vm2, %v2208_v14, 0.0  ;;  %v2210_v36 = vadd.f32 %v2168_v31, %v3915_v50  ;;  %v2172_v38 = vmul.f32 0.6931472, %v2835_v4  ;;  %v3924_v4 = vld [vmem:[#allocation27_spill] sm:$0xff] }
 0x17b   :  { %v2839_v40 = vpop.eup %2838  ;;  %v2261_v47 = vsel %vm2221_vm2, %v2209_v3, 0.0  ;;  %v2211_v59 = vadd.f32 %v2170_v45, %v3916_v39  ;;  %2850 = vlog2.f32 %v2124_v7  ;;  %v2174_v52 = vmul.f32 0.6931472, %v2837_v10  ;;  %v3925_v10 = vld [vmem:[#allocation28_spill] sm:$0xff] }
 0x17c   :  { %v2256_v62 = vadd.f32 %v2255_v8, %v2254_v30  ;;  %v2841_v44 = vpop.eup %2840  ;;  %v2263_v32 = vsel %vm2221_vm2, %v2210_v36, 0.0  ;;  %v2212_v61 = vadd.f32 %v2172_v38, %v3917_v27  ;;  %v2176_v49 = vmul.f32 0.6931472, %v2839_v40 }
 0x17d   :  { %v2843_v51 = vpop.eup %2842  ;;  %v2178_v1 = vmul.f32 0.6931472, %v2841_v44  ;;  %v2265_v2 = vsel %vm2221_vm2, %v2211_v59, 0.0  ;;  %v2213_v48 = vadd.f32 %v2174_v52, %v3918_v16 }
 0x17e   :  { %v2258_v15 = vadd.f32 %v2257_v23, %v2256_v62  ;;  %v2180_v9 = vmul.f32 0.6931472, %v2843_v51  ;;  %v2267_v41 = vsel %vm2221_vm2, %v2212_v61, 0.0  ;;  %v2214_v22 = vadd.f32 %v2176_v49, %v3919_v5  ;;  %v2845_v21 = vpop.eup %2844 }
 0x17f   :  { %v2215_v60 = vadd.f32 %v2178_v1, %v3920_v20  ;;  %v2269_v63 = vsel %vm2221_vm2, %v2213_v48, 0.0  ;;  %v2182_v37 = vmul.f32 0.6931472, %v2845_v21 }
 0x180   :  { %v2260_v56 = vadd.f32 %v2259_v17, %v2258_v15  ;;  %v2216_v28 = vadd.f32 %v2180_v9, %v3921_v58  ;;  %v2271_v53 = vsel %vm2221_vm2, %v2214_v22, 0.0 }
 0x181   :  { %v2847_v35 = vpop.eup %2846  ;;  %v2273_v12 = vsel %vm2221_vm2, %v2215_v60, 0.0  ;;  %v2217_v42 = vadd.f32 %v2182_v37, %v3922_v43 }
 0x182   :  { %v2262_v33 = vadd.f32 %v2261_v47, %v2260_v56  ;;  %v2184_v11 = vmul.f32 0.6931472, %v2847_v35  ;;  %v2275_v34 = vsel %vm2221_vm2, %v2216_v28, 0.0 }
 0x183   :  { %v2849_v46 = vpop.eup %2848  ;;  %v2277_v31 = vsel %vm2221_vm2, %v2217_v42, 0.0 }
 0x184   :  { %v2264_v55 = vadd.f32 %v2263_v32, %v2262_v33  ;;  %v2218_v29 = vadd.f32 %v2184_v11, %v3923_v54  ;;  %v2186_v19 = vmul.f32 0.6931472, %v2849_v46 }
 0x185   :  { %v2851_v24 = vpop.eup %2850 }
 0x186   :  { %v2266_v13 = vadd.f32 %v2265_v2, %v2264_v55  ;;  %v2188_v8 = vmul.f32 0.6931472, %v2851_v24  ;;  %v2219_v30 = vadd.f32 %v2186_v19, %v3924_v4  ;;  %v2279_v62 = vsel %vm2221_vm2, %v2218_v29, 0.0 }
 0x188   :  { %v2268_v25 = vadd.f32 %v2267_v41, %v2266_v13  ;;  %v2220_v23 = vadd.f32 %v2188_v8, %v3925_v10  ;;  %v2281_v45 = vsel %vm2221_vm2, %v2219_v30, 0.0 }
 0x18a   :  { %v2270_v6 = vadd.f32 %v2269_v63, %v2268_v25  ;;  %v2283_v18 = vsel %vm2221_vm2, %v2220_v23, 0.0 }
 0x18c   :  { %v2272_v26 = vadd.f32 %v2271_v53, %v2270_v6 }
 0x18e   :  { %v2274_v57 = vadd.f32 %v2273_v12, %v2272_v26 }
 0x190   :  { %v2276_v14 = vadd.f32 %v2275_v34, %v2274_v57 }
 0x192   :  { %v2278_v0 = vadd.f32 %v2277_v31, %v2276_v14 }
 0x194   :  { %v2280_v3 = vadd.f32 %v2279_v62, %v2278_v0 }
 0x196   :  { %v2282_v40 = vadd.f32 %v2281_v45, %v2280_v3 }
 0x198   :  { %v2284_v17 = vadd.f32 %v2283_v18, %v2282_v40 }
 0x19a   :  { %2285 = vadd.xlane.f32.xlu0 %v2284_v17 }
 0x204   :  { %v2327_v50 = vpop.xlane.xlu1 %2326 }
 0x205   :  { %v2328_v36 = vrot.slane %v2327_v50, 4 }
 0x207   :  { %v2329_v38 = vadd.f32 %v2328_v36, %v2327_v50 }
 0x209   :  { %v2330_v7 = vrot.slane %v2329_v38, 2 }
 0x20b   :  { %v2331_v39 = vadd.f32 %v2330_v7, %v2329_v38 }
 0x20d   :  { %v2332_v32 = vrot.slane %v2331_v39, 1 }
 0x20f   :  { %v2333_v52 = vadd.f32 %v2332_v32, %v2331_v39 }
 0x227   :  { %v2286_v15 = vpop.xlane.xlu0 %2285 }
 0x228   :  { %v2287_v56 = vrot.slane %v2286_v15, 4 }
 0x22a   :  { %v2288_v47 = vadd.f32 %v2287_v56, %v2286_v15 }
 0x22c   :  { %v2289_v59 = vrot.slane %v2288_v47, 2 }
 0x22e   :  { %v2290_v44 = vadd.f32 %v2289_v59, %v2288_v47 }
 0x230   :  { %v2291_v27 = vrot.slane %v2290_v44, 1 }
 0x232   :  { %v2292_v61 = vadd.f32 %v2291_v27, %v2290_v44 }
 0x234   :  { %2623 = vpush %v2292_v61 }
 0x235   :  { %2625 = vpush %v2333_v52 }
 0x265   :  { %s2624_s1 = spop %2623 }
 0x266   :  { %s2626_s24 = spop %2625 }
 0x267   :  { %s2335_s25 = ssub.f32 %s2624_s1, %s2626_s24 }
 0x269   :  { %2337 = sst [smem:[#allocation2]] %s2335_s25 }
 0x26a   :  { %2861 = shalt.err (!%p2858_p2)
}
 0x26b   :  { %s2864_s5 = smov [#allocation2]  }
 0x26c   :  { %2345 = dma.smem_to_hbm %s2864_s5, 16, %s3853_s2, [#allocation3]  }
 0x26d   :  { %2862 = dma.done.wait [#allocation3], 16  }
 0x26e   :  { %2863 = vsyncadd [#allocation3], 4294967280 }
 0x26f   :  { %2349 = sfence }
 0x270   :  { %2350 = vsyncpa [#allocation3], 1 }

</bundles_post_ra>
